<compile_context>
chip_gen: v7x
topology: tpu7x:2x2x1
jax: 0.10.0
libtpu: 0.0.40
codegen_flags: <defaults>
</compile_context>

<pallas_src>
import functools

import numpy as np

import jax
import jax.numpy as jnp
from jax.experimental import pallas as pl
from jax.experimental.pallas import tpu as pltpu

LANE = 128


# ----------------------------------------------------------------------------
# small helpers (run once at init / trace — no per-step cost)
# ----------------------------------------------------------------------------
def _round_up(n, m):
    return ((n + m - 1) // m) * m


def _vmem_limit_bytes():
    """Generation-aware scoped-VMEM budget (v5e/v6e: 128 MiB physical, v7x: 64 MiB)."""
    default = 32 * 1024 * 1024
    try:
        cap = getattr(pltpu.get_tpu_info(), "vmem_capacity_bytes", None)
        if cap:
            # leave ~25% headroom: v5e/v6e -> ~96 MiB, v7x -> ~48 MiB
            return int(min(max(default, (cap * 3) // 4), 100 * 1024 * 1024))
    except Exception:
        pass
    return default


def _prep_phase_packed_input(images_nchw):
    """NCHW image -> mod-4 phase-packed, lane-dense conv1 input.

    Returns xq of shape (B, H/4+1, W/4+1, 16*Cin) bf16 with
        xq[b, a, c, Cin*(4m+n)+ch] = x_pad[b, 4a+m, 4c+n, ch]
    where x_pad is the NHWC image zero-padded by (1 top/left, 3 bottom/right).
    This is the only XLA-side data movement (3-channel image, ~2x input bytes);
    every other intermediate lives in VMEM inside the fused kernel.
    """
    B, Cin, H, W = images_nchw.shape
    x = jnp.transpose(images_nchw, (0, 2, 3, 1)).astype(jnp.bfloat16)      # NHWC
    xp = jnp.pad(x, ((0, 0), (1, 3), (1, 3), (0, 0)))
    hq, wq = (H + 4) // 4, (W + 4) // 4
    xp = xp.reshape(B, hq, 4, wq, 4, Cin)
    xp = jnp.transpose(xp, (0, 1, 3, 2, 4, 5))                              # (B,a,c,m,n,ch)
    return xp.reshape(B, hq, wq, 16 * Cin)


def _fold_conv1(w1, b1):
    """Fold conv1's 3x3/s2 taps + mod-4 phase selection into 9 dense matmuls.

    w1: (C1, Cin, 3, 3) torch layout.
    Returns
      w1fold : (9, 16*Cin, 4*C1) bf16 group weights (output columns live in the
               16*parity lane slot the conv2 stage expects; unused rows/cols are zero)
      b1fold : (4, 4*C1) f32 per-output-parity bias rows
      groups : tuple over output parity (s,t) [index 2s+t] of ((g, row_off, col_off), ...)
    """
    c1, cin = int(w1.shape[0]), int(w1.shape[1])
    kin, kout = 16 * cin, 4 * c1
    w1 = np.asarray(w1, np.float32)
    mats, groups = [], [[] for _ in range(4)]
    g = 0
    for s in (0, 1):
        for t in (0, 1):
            slot = 2 * s + t
            by_off = {}
            for di in range(3):
                for dj in range(3):
                    orow, m = divmod(2 * s + di, 4)
                    ocol, n = divmod(2 * t + dj, 4)
                    by_off.setdefault((orow, ocol), []).append((di, dj, m, n))
            for (orow, ocol) in sorted(by_off):
                W = np.zeros((kin, kout), np.float32)
                for di, dj, m, n in by_off[(orow, ocol)]:
                    W[cin * (4 * m + n): cin * (4 * m + n) + cin,
                      c1 * slot: c1 * (slot + 1)] = w1[:, :, di, dj].T       # (Cin, C1)
                mats.append(W)
                groups[slot].append((g, orow, ocol))
                g += 1
    b1fold = np.zeros((4, kout), np.float32)
    for slot in range(4):
        b1fold[slot, c1 * slot: c1 * (slot + 1)] = np.asarray(b1, np.float32)
    return (jnp.asarray(np.stack(mats), jnp.bfloat16),
            jnp.asarray(b1fold),
            tuple(tuple(x) for x in groups))


def _fold_conv2(w2, c2_pad):
    """Fold conv2's 9 taps into 4 matmuls over the parity-packed lane dim (K = 4*C1).

    w2: (C2, C1, 3, 3) torch layout -> (4 groups by window offset, 4*C1, C2_pad) bf16.
    """
    c2, c1 = int(w2.shape[0]), int(w2.shape[1])
    w2 = np.asarray(w2, np.float32)
    out = np.zeros((4, 4 * c1, c2_pad), np.float32)
    for di in range(3):
        for dj in range(3):
            s, t = 1 - di % 2, 1 - dj % 2          # parity slot holding this tap's rows
            grp = 2 * (di // 2) + (dj // 2)        # window offset group
            slot = 2 * s + t
            out[grp, c1 * slot: c1 * (slot + 1), :c2] = w2[:, :, di, dj].T   # (C1, C2)
    return jnp.asarray(out, jnp.bfloat16)


# ----------------------------------------------------------------------------
# fused Pallas kernel: conv1 -> ReLU -> conv2 -> ReLU -> avg pool -> Linear
# ----------------------------------------------------------------------------
def _fused_encoder_kernel(xq_ref, w1_ref, b1_ref, w2_ref, b2_ref, we_ref, be_ref,
                          o_ref, yph_ref, *, h2, w2, conv1_groups, inv_hw):
    """Whole frozen backbone for ONE image.

    xq_ref : (1, h2+1, w2+1, 16*Cin) bf16  mod-4 phase-packed padded input
    w1_ref : (9, 16*Cin, 4*C1) bf16        folded conv1 group weights
    b1_ref : (4, 4*C1) f32                 per-parity conv1 bias
    w2_ref : (4, 4*C1, C2p) bf16           folded conv2 group weights
    b2_ref : (1, C2p) f32
    we_ref : (C2p, Ep) bf16, be_ref : (1, Ep) f32
    o_ref  : (1, 1, Ep) f32
    yph_ref: VMEM (h2+1, w2+1, 4*C1) bf16  parity-packed conv1 output (conv2's input)
    """
    c1p4 = yph_ref.shape[-1]

    # Fresh parity buffer for this image: borders must be zero, interiors are ADDed below.
    yph_ref[...] = jnp.zeros_like(yph_ref)

    # ---- stage 1: conv1 (+bias, ReLU), computed directly as the 4 parity quarters of its
    # output and accumulated into the phase-packed layout conv2 consumes.  Each group is
    # one dense (h2*w2, 16*Cin) @ (16*Cin, 4*C1) matmul (f32 MXU accumulation). ----
    for pidx in range(4):
        s, t = pidx // 2, pidx % 2
        acc = jnp.zeros((h2 * w2, c1p4), jnp.float32)
        for (g, orow, ocol) in conv1_groups[pidx]:
            win = xq_ref[0, orow:orow + h2, ocol:ocol + w2, :]
            acc = acc + jnp.dot(win.reshape(h2 * w2, win.shape[-1]), w1_ref[g],
                                preferred_element_type=jnp.float32)
        v = jnp.maximum(acc + b1_ref[pidx:pidx + 1, :], 0.0)
        yph_ref[s:s + h2, t:t + w2, :] += v.reshape(h2, w2, c1p4).astype(yph_ref.dtype)

    # ---- stage 2: conv2 (+bias, ReLU): 9 taps folded into 4 matmuls with K = 4*C1 over
    # the parity-packed lanes; the feature map stays in registers/VMEM (never hits HBM). ----
    c2p = b2_ref.shape[-1]
    acc2 = jnp.zeros((h2 * w2, c2p), jnp.float32)
    for grp in range(4):
        ro, co = grp // 2, grp % 2
        win = yph_ref[ro:ro + h2, co:co + w2, :]
        acc2 = acc2 + jnp.dot(win.reshape(h2 * w2, c1p4), w2_ref[grp],
                              preferred_element_type=jnp.float32)
    z = jnp.maximum(acc2 + b2_ref[...], 0.0)

    # ---- stage 3 (epilogue): AdaptiveAvgPool2d((1,1)) + view(B,-1) + Linear(embed) ----
    pooled = (jnp.sum(z, axis=0, keepdims=True) * inv_hw).astype(we_ref.dtype)   # (1, C2p)
    emb = jnp.dot(pooled, we_ref[...], preferred_element_type=jnp.float32) + be_ref[...]
    o_ref[0] = emb.astype(o_ref.dtype)


def fused_encoder(xq, w1fold, b1fold, w2fold, b2, w_embed, b_embed, *,
                  h2, w2, conv1_groups):
    """Grid over the batch ("parallel" => split across TensorCores on v7x); one image per
    step; all weights resident; output is the lane-dense (B, 1, Ep) embedding."""
    B, hq, wq, kin = xq.shape
    c1p4 = w2fold.shape[1]
    ep = w_embed.shape[-1]
    kernel = functools.partial(_fused_encoder_kernel, h2=h2, w2=w2,
                               conv1_groups=conv1_groups,
                               inv_hw=1.0 / float(h2 * w2))
    return pl.pallas_call(
        kernel,
        out_shape=jax.ShapeDtypeStruct((B, 1, ep), jnp.float32),
        grid=(B,),
        in_specs=[
            pl.BlockSpec((1, hq, wq, kin), lambda b: (b, 0, 0, 0)),
            pl.BlockSpec(w1fold.shape, lambda b: (0, 0, 0)),
            pl.BlockSpec(b1fold.shape, lambda b: (0, 0)),
            pl.BlockSpec(w2fold.shape, lambda b: (0, 0, 0)),
            pl.BlockSpec(b2.shape, lambda b: (0, 0)),
            pl.BlockSpec(w_embed.shape, lambda b: (0, 0)),
            pl.BlockSpec(b_embed.shape, lambda b: (0, 0)),
        ],
        out_specs=pl.BlockSpec((1, 1, ep), lambda b: (b, 0, 0)),
        scratch_shapes=[pltpu.VMEM((h2 + 1, w2 + 1, c1p4), jnp.bfloat16)],
        compiler_params=pltpu.CompilerParams(
            dimension_semantics=("parallel",),
            vmem_limit_bytes=_vmem_limit_bytes(),
        ),
    )(xq, w1fold, b1fold, w2fold, b2, w_embed, b_embed)


# ----------------------------------------------------------------------------
# Module
# ----------------------------------------------------------------------------
class EncoderCNN:
    """JAX/Pallas port of the PyTorch EncoderCNN forward pass (synthetic frozen weights).

    forward: images (B,3,H,W) -> frozen conv backbone -> global avg pool -> Linear(embed).
    """

    def __init__(self, embed_size, feat_channels=128, key=None):
        if key is None:
            key = jax.random.PRNGKey(0)
        k1, k2, k3, k4, k5, k6 = jax.random.split(key, 6)
        c1 = 16
        # frozen surrogate backbone (stand-in for frozen pretrained ResNet-50 children[:-1])
        conv1_w = 0.1 * jax.random.normal(k1, (c1, 3, 3, 3), jnp.float32)
        conv1_b = 0.1 * jax.random.normal(k2, (c1,), jnp.float32)
        conv2_w = 0.1 * jax.random.normal(k3, (feat_channels, c1, 3, 3), jnp.float32)
        conv2_b = 0.1 * jax.random.normal(k4, (feat_channels,), jnp.float32)
        # nn.Linear(in_features, embed_size): weight (E, C), bias (E,)
        embed_w = 0.05 * jax.random.normal(k5, (embed_size, feat_channels), jnp.float32)
        embed_b = 0.05 * jax.random.normal(k6, (embed_size,), jnp.float32)

        self.embed_size = embed_size
        self.feat_channels = feat_channels
        self.c1 = c1
        # raw f32 copies kept for the pure-JAX reference check
        self.params = dict(conv1_w=conv1_w, conv1_b=conv1_b, conv2_w=conv2_w,
                           conv2_b=conv2_b, embed_w=embed_w, embed_b=embed_b)

        c2p = _round_up(feat_channels, LANE)     # 128 -> 128 (lane-dense conv2 output)
        ep = _round_up(embed_size, LANE)         # 32  -> 128 (sliced back after the kernel)

        # folded, lane-dense bf16 kernel operands (zero padding keeps exact math:
        # padded channels see zero weights + zero bias, and ReLU(0) == 0)
        self.w1fold, self.b1fold, self.conv1_groups = _fold_conv1(conv1_w, conv1_b)
        self.w2fold = _fold_conv2(conv2_w, c2p)                       # (4, 4*C1, 128)
        b2 = np.zeros((1, c2p), np.float32)
        b2[0, :feat_channels] = np.asarray(conv2_b, np.float32)
        self.b2 = jnp.asarray(b2)
        we = np.zeros((c2p, ep), np.float32)
        we[:feat_channels, :embed_size] = np.asarray(embed_w, np.float32).T
        self.w_embed = jnp.asarray(we, jnp.bfloat16)
        be = np.zeros((1, ep), np.float32)
        be[0, :embed_size] = np.asarray(embed_b, np.float32)
        self.b_embed = jnp.asarray(be)

        self._forward = jax.jit(self._forward_impl)

    def _forward_impl(self, images):
        # images: (B, 3, H, W) float32, NCHW (PyTorch convention)
        B, cin, H, W = images.shape
        assert cin == 3, "surrogate backbone expects RGB input"
        assert H % 4 == 0 and W % 4 == 0, "two stride-2 convs need H, W divisible by 4"
        xq = _prep_phase_packed_input(images)                     # (B, H/4+1, W/4+1, 48)
        out = fused_encoder(xq, self.w1fold, self.b1fold, self.w2fold, self.b2,
                            self.w_embed, self.b_embed,
                            h2=H // 4, w2=W // 4, conv1_groups=self.conv1_groups)
        return out[:, 0, :self.embed_size]                        # (B, embed_size) f32

    def __call__(self, images):
        return self._forward(images)


# ----------------------------------------------------------------------------
# pure-JAX f32 reference (same surrogate forward) for the self-check
# ----------------------------------------------------------------------------
def _reference_forward(images, params):
    x = jnp.transpose(images, (0, 2, 3, 1)).astype(jnp.float32)   # NHWC

    def conv_s2(x, w, b):
        w_hwio = jnp.transpose(w, (2, 3, 1, 0))
        y = jax.lax.conv_general_dilated(
            x, w_hwio, window_strides=(2, 2), padding=((1, 1), (1, 1)),
            dimension_numbers=("NHWC", "HWIO", "NHWC"),
            precision=jax.lax.Precision.HIGHEST)
        return jax.nn.relu(y + b)

    f = conv_s2(x, params["conv1_w"], params["conv1_b"])
    f = conv_s2(f, params["conv2_w"], params["conv2_b"])
    pooled = jnp.mean(f, axis=(1, 2))                             # AdaptiveAvgPool2d((1,1))
    return pooled @ params["embed_w"].T + params["embed_b"]


# ----------------------------------------------------------------------------
# Demo
# ----------------------------------------------------------------------------
if __name__ == "__main__":
    embed_size = 32
    batch, channels, spatial = 2, 3, 16
    images = jax.random.normal(jax.random.PRNGKey(0),
                               (batch, channels, spatial, spatial), jnp.float32)

    encoder = EncoderCNN(embed_size)
    features = jax.block_until_ready(encoder(images))

    assert features.shape == (batch, embed_size), features.shape
    assert features.dtype == jnp.float32
    assert bool(jnp.all(jnp.isfinite(features)))

    ref = _reference_forward(images, encoder.params)
    max_err = float(jnp.max(jnp.abs(features - ref)))
    assert max_err < 3e-2, f"kernel vs f32 reference mismatch: max abs err {max_err}"
    print("KERNEL_OK")
</pallas_src>

<mosaic_0001>
module attributes {stable_mosaic.version = 11 : i64} {
  func.func @_fused_encoder_kernel(%arg0: i32, %arg1: memref<1x5x5x48xbf16, #tpu.memory_space<vmem>>, %arg2: memref<9x48x64xbf16, #tpu.memory_space<vmem>>, %arg3: memref<4x64xf32, #tpu.memory_space<vmem>>, %arg4: memref<4x64x128xbf16, #tpu.memory_space<vmem>>, %arg5: memref<1x128xf32, #tpu.memory_space<vmem>>, %arg6: memref<128x128xbf16, #tpu.memory_space<vmem>>, %arg7: memref<1x128xf32, #tpu.memory_space<vmem>>, %arg8: memref<1x1x128xf32, #tpu.memory_space<vmem>>, %arg9: memref<5x5x64xbf16, #tpu.memory_space<vmem>>) attributes {dimension_semantics = [#tpu.dimension_semantics<parallel>], iteration_bounds = array<i64: 2>, scalar_prefetch = 0 : i64, scratch_operands = 1 : i64, tpu.core_type = #tpu.core_type<tc>, window_params = [{transform_indices = @transform_0, window_bounds = array<i64: 1, 5, 5, 48>}, {pipeline_mode = #tpu.pipeline_mode<synchronous>, transform_indices = @transform_1, window_bounds = array<i64: 9, 48, 64>}, {pipeline_mode = #tpu.pipeline_mode<synchronous>, transform_indices = @transform_2, window_bounds = array<i64: 4, 64>}, {pipeline_mode = #tpu.pipeline_mode<synchronous>, transform_indices = @transform_3, window_bounds = array<i64: 4, 64, 128>}, {pipeline_mode = #tpu.pipeline_mode<synchronous>, transform_indices = @transform_4, window_bounds = array<i64: 1, 128>}, {pipeline_mode = #tpu.pipeline_mode<synchronous>, transform_indices = @transform_5, window_bounds = array<i64: 128, 128>}, {pipeline_mode = #tpu.pipeline_mode<synchronous>, transform_indices = @transform_6, window_bounds = array<i64: 1, 128>}, {transform_indices = @transform_7, window_bounds = array<i64: 1, 1, 128>}]} {
    %cst = arith.constant 0.000000e+00 : bf16
    %0 = vector.broadcast %cst : bf16 to vector<5x5x64xbf16>
    %c0 = arith.constant 0 : index
    %c0_0 = arith.constant 0 : index
    %c0_1 = arith.constant 0 : index
    %1 = vector.load %arg9[%c0, %c0_0, %c0_1] : memref<5x5x64xbf16, #tpu.memory_space<vmem>>, vector<5x5x64xbf16>
    tpu.vector_store %arg9[%c0, %c0_0, %c0_1], %0 {strides = array<i32>} : memref<5x5x64xbf16, #tpu.memory_space<vmem>>, vector<5x5x64xbf16>,
    %cst_2 = arith.constant 0.000000e+00 : f32
    %2 = vector.broadcast %cst_2 : f32 to vector<16x64xf32>
    %c0_3 = arith.constant 0 : index
    %c0_4 = arith.constant 0 : index
    %c0_5 = arith.constant 0 : index
    %c0_6 = arith.constant 0 : index
    %3 = vector.load %arg1[%c0_3, %c0_4, %c0_5, %c0_6] : memref<1x5x5x48xbf16, #tpu.memory_space<vmem>>, vector<1x4x4x48xbf16>
    %4 = vector.shape_cast %3 : vector<1x4x4x48xbf16> to vector<4x4x48xbf16>
    %5 = vector.shape_cast %4 : vector<4x4x48xbf16> to vector<16x48xbf16>
    %c0_7 = arith.constant 0 : index
    %c0_8 = arith.constant 0 : index
    %c0_9 = arith.constant 0 : index
    %6 = vector.load %arg2[%c0_7, %c0_8, %c0_9] : memref<9x48x64xbf16, #tpu.memory_space<vmem>>, vector<1x48x64xbf16>
    %7 = vector.shape_cast %6 : vector<1x48x64xbf16> to vector<48x64xbf16>
    %cst_10 = arith.constant dense<0.000000e+00> : vector<16x64xf32>
    %8 = tpu.matmul %5, %7, %cst_10 {dimension_numbers = #tpu.dot_dimension_numbers<[1], [0], [0], [1], [0, 0, 1, 1], [], []>} : vector<16x48xbf16>, vector<48x64xbf16>, vector<16x64xf32> -> vector<16x64xf32>
    %9 = arith.addf %2, %8 : vector<16x64xf32>
    %c0_11 = arith.constant 0 : index
    %c0_12 = arith.constant 0 : index
    %10 = vector.load %arg3[%c0_11, %c0_12] : memref<4x64xf32, #tpu.memory_space<vmem>>, vector<1x64xf32>
    %11 = vector.broadcast %10 : vector<1x64xf32> to vector<16x64xf32>
    %12 = arith.addf %9, %11 : vector<16x64xf32>
    %cst_13 = arith.constant 0.000000e+00 : f32
    %13 = vector.broadcast %cst_13 : f32 to vector<16x64xf32>
    %14 = arith.maximumf %12, %13 : vector<16x64xf32>
    %c0_14 = arith.constant 0 : index
    %c0_15 = arith.constant 0 : index
    %c0_16 = arith.constant 0 : index
    %15 = vector.load %arg9[%c0_14, %c0_15, %c0_16] : memref<5x5x64xbf16, #tpu.memory_space<vmem>>, vector<4x4x64xbf16>
    %16 = vector.shape_cast %14 : vector<16x64xf32> to vector<4x4x64xf32>
    %17 = arith.truncf %16 : vector<4x4x64xf32> to vector<4x4x64xbf16>
    %18 = arith.addf %15, %17 : vector<4x4x64xbf16>
    %c0_17 = arith.constant 0 : index
    %c0_18 = arith.constant 0 : index
    %c0_19 = arith.constant 0 : index
    %19 = vector.load %arg9[%c0_17, %c0_18, %c0_19] : memref<5x5x64xbf16, #tpu.memory_space<vmem>>, vector<4x4x64xbf16>
    tpu.vector_store %arg9[%c0_17, %c0_18, %c0_19], %18 {strides = array<i32>} : memref<5x5x64xbf16, #tpu.memory_space<vmem>>, vector<4x4x64xbf16>,
    %cst_20 = arith.constant 0.000000e+00 : f32
    %20 = vector.broadcast %cst_20 : f32 to vector<16x64xf32>
    %c0_21 = arith.constant 0 : index
    %c0_22 = arith.constant 0 : index
    %c0_23 = arith.constant 0 : index
    %c0_24 = arith.constant 0 : index
    %21 = vector.load %arg1[%c0_21, %c0_22, %c0_23, %c0_24] : memref<1x5x5x48xbf16, #tpu.memory_space<vmem>>, vector<1x4x4x48xbf16>
    %22 = vector.shape_cast %21 : vector<1x4x4x48xbf16> to vector<4x4x48xbf16>
    %23 = vector.shape_cast %22 : vector<4x4x48xbf16> to vector<16x48xbf16>
    %c1 = arith.constant 1 : index
    %c0_25 = arith.constant 0 : index
    %c0_26 = arith.constant 0 : index
    %24 = vector.load %arg2[%c1, %c0_25, %c0_26] : memref<9x48x64xbf16, #tpu.memory_space<vmem>>, vector<1x48x64xbf16>
    %25 = vector.shape_cast %24 : vector<1x48x64xbf16> to vector<48x64xbf16>
    %cst_27 = arith.constant dense<0.000000e+00> : vector<16x64xf32>
    %26 = tpu.matmul %23, %25, %cst_27 {dimension_numbers = #tpu.dot_dimension_numbers<[1], [0], [0], [1], [0, 0, 1, 1], [], []>} : vector<16x48xbf16>, vector<48x64xbf16>, vector<16x64xf32> -> vector<16x64xf32>
    %27 = arith.addf %20, %26 : vector<16x64xf32>
    %c0_28 = arith.constant 0 : index
    %c0_29 = arith.constant 0 : index
    %c1_30 = arith.constant 1 : index
    %c0_31 = arith.constant 0 : index
    %28 = vector.load %arg1[%c0_28, %c0_29, %c1_30, %c0_31] : memref<1x5x5x48xbf16, #tpu.memory_space<vmem>>, vector<1x4x4x48xbf16>
    %29 = vector.shape_cast %28 : vector<1x4x4x48xbf16> to vector<4x4x48xbf16>
    %30 = vector.shape_cast %29 : vector<4x4x48xbf16> to vector<16x48xbf16>
    %c2 = arith.constant 2 : index
    %c0_32 = arith.constant 0 : index
    %c0_33 = arith.constant 0 : index
    %31 = vector.load %arg2[%c2, %c0_32, %c0_33] : memref<9x48x64xbf16, #tpu.memory_space<vmem>>, vector<1x48x64xbf16>
    %32 = vector.shape_cast %31 : vector<1x48x64xbf16> to vector<48x64xbf16>
    %cst_34 = arith.constant dense<0.000000e+00> : vector<16x64xf32>
    %33 = tpu.matmul %30, %32, %cst_34 {dimension_numbers = #tpu.dot_dimension_numbers<[1], [0], [0], [1], [0, 0, 1, 1], [], []>} : vector<16x48xbf16>, vector<48x64xbf16>, vector<16x64xf32> -> vector<16x64xf32>
    %34 = arith.addf %27, %33 : vector<16x64xf32>
    %c1_35 = arith.constant 1 : index
    %c0_36 = arith.constant 0 : index
    %35 = vector.load %arg3[%c1_35, %c0_36] : memref<4x64xf32, #tpu.memory_space<vmem>>, vector<1x64xf32>
    %36 = vector.broadcast %35 : vector<1x64xf32> to vector<16x64xf32>
    %37 = arith.addf %34, %36 : vector<16x64xf32>
    %cst_37 = arith.constant 0.000000e+00 : f32
    %38 = vector.broadcast %cst_37 : f32 to vector<16x64xf32>
    %39 = arith.maximumf %37, %38 : vector<16x64xf32>
    %c0_38 = arith.constant 0 : index
    %c1_39 = arith.constant 1 : index
    %c0_40 = arith.constant 0 : index
    %40 = vector.load %arg9[%c0_38, %c1_39, %c0_40] : memref<5x5x64xbf16, #tpu.memory_space<vmem>>, vector<4x4x64xbf16>
    %41 = vector.shape_cast %39 : vector<16x64xf32> to vector<4x4x64xf32>
    %42 = arith.truncf %41 : vector<4x4x64xf32> to vector<4x4x64xbf16>
    %43 = arith.addf %40, %42 : vector<4x4x64xbf16>
    %c0_41 = arith.constant 0 : index
    %c1_42 = arith.constant 1 : index
    %c0_43 = arith.constant 0 : index
    %44 = vector.load %arg9[%c0_41, %c1_42, %c0_43] : memref<5x5x64xbf16, #tpu.memory_space<vmem>>, vector<4x4x64xbf16>
    tpu.vector_store %arg9[%c0_41, %c1_42, %c0_43], %43 {strides = array<i32>} : memref<5x5x64xbf16, #tpu.memory_space<vmem>>, vector<4x4x64xbf16>,
    %cst_44 = arith.constant 0.000000e+00 : f32
    %45 = vector.broadcast %cst_44 : f32 to vector<16x64xf32>
    %c0_45 = arith.constant 0 : index
    %c0_46 = arith.constant 0 : index
    %c0_47 = arith.constant 0 : index
    %c0_48 = arith.constant 0 : index
    %46 = vector.load %arg1[%c0_45, %c0_46, %c0_47, %c0_48] : memref<1x5x5x48xbf16, #tpu.memory_space<vmem>>, vector<1x4x4x48xbf16>
    %47 = vector.shape_cast %46 : vector<1x4x4x48xbf16> to vector<4x4x48xbf16>
    %48 = vector.shape_cast %47 : vector<4x4x48xbf16> to vector<16x48xbf16>
    %c3 = arith.constant 3 : index
    %c0_49 = arith.constant 0 : index
    %c0_50 = arith.constant 0 : index
    %49 = vector.load %arg2[%c3, %c0_49, %c0_50] : memref<9x48x64xbf16, #tpu.memory_space<vmem>>, vector<1x48x64xbf16>
    %50 = vector.shape_cast %49 : vector<1x48x64xbf16> to vector<48x64xbf16>
    %cst_51 = arith.constant dense<0.000000e+00> : vector<16x64xf32>
    %51 = tpu.matmul %48, %50, %cst_51 {dimension_numbers = #tpu.dot_dimension_numbers<[1], [0], [0], [1], [0, 0, 1, 1], [], []>} : vector<16x48xbf16>, vector<48x64xbf16>, vector<16x64xf32> -> vector<16x64xf32>
    %52 = arith.addf %45, %51 : vector<16x64xf32>
    %c0_52 = arith.constant 0 : index
    %c1_53 = arith.constant 1 : index
    %c0_54 = arith.constant 0 : index
    %c0_55 = arith.constant 0 : index
    %53 = vector.load %arg1[%c0_52, %c1_53, %c0_54, %c0_55] : memref<1x5x5x48xbf16, #tpu.memory_space<vmem>>, vector<1x4x4x48xbf16>
    %54 = vector.shape_cast %53 : vector<1x4x4x48xbf16> to vector<4x4x48xbf16>
    %55 = vector.shape_cast %54 : vector<4x4x48xbf16> to vector<16x48xbf16>
    %c4 = arith.constant 4 : index
    %c0_56 = arith.constant 0 : index
    %c0_57 = arith.constant 0 : index
    %56 = vector.load %arg2[%c4, %c0_56, %c0_57] : memref<9x48x64xbf16, #tpu.memory_space<vmem>>, vector<1x48x64xbf16>
    %57 = vector.shape_cast %56 : vector<1x48x64xbf16> to vector<48x64xbf16>
    %cst_58 = arith.constant dense<0.000000e+00> : vector<16x64xf32>
    %58 = tpu.matmul %55, %57, %cst_58 {dimension_numbers = #tpu.dot_dimension_numbers<[1], [0], [0], [1], [0, 0, 1, 1], [], []>} : vector<16x48xbf16>, vector<48x64xbf16>, vector<16x64xf32> -> vector<16x64xf32>
    %59 = arith.addf %52, %58 : vector<16x64xf32>
    %c2_59 = arith.constant 2 : index
    %c0_60 = arith.constant 0 : index
    %60 = vector.load %arg3[%c2_59, %c0_60] : memref<4x64xf32, #tpu.memory_space<vmem>>, vector<1x64xf32>
    %61 = vector.broadcast %60 : vector<1x64xf32> to vector<16x64xf32>
    %62 = arith.addf %59, %61 : vector<16x64xf32>
    %cst_61 = arith.constant 0.000000e+00 : f32
    %63 = vector.broadcast %cst_61 : f32 to vector<16x64xf32>
    %64 = arith.maximumf %62, %63 : vector<16x64xf32>
    %c1_62 = arith.constant 1 : index
    %c0_63 = arith.constant 0 : index
    %c0_64 = arith.constant 0 : index
    %65 = vector.load %arg9[%c1_62, %c0_63, %c0_64] : memref<5x5x64xbf16, #tpu.memory_space<vmem>>, vector<4x4x64xbf16>
    %66 = vector.shape_cast %64 : vector<16x64xf32> to vector<4x4x64xf32>
    %67 = arith.truncf %66 : vector<4x4x64xf32> to vector<4x4x64xbf16>
    %68 = arith.addf %65, %67 : vector<4x4x64xbf16>
    %c1_65 = arith.constant 1 : index
    %c0_66 = arith.constant 0 : index
    %c0_67 = arith.constant 0 : index
    %69 = vector.load %arg9[%c1_65, %c0_66, %c0_67] : memref<5x5x64xbf16, #tpu.memory_space<vmem>>, vector<4x4x64xbf16>
    tpu.vector_store %arg9[%c1_65, %c0_66, %c0_67], %68 {strides = array<i32>} : memref<5x5x64xbf16, #tpu.memory_space<vmem>>, vector<4x4x64xbf16>,
    %cst_68 = arith.constant 0.000000e+00 : f32
    %70 = vector.broadcast %cst_68 : f32 to vector<16x64xf32>
    %c0_69 = arith.constant 0 : index
    %c0_70 = arith.constant 0 : index
    %c0_71 = arith.constant 0 : index
    %c0_72 = arith.constant 0 : index
    %71 = vector.load %arg1[%c0_69, %c0_70, %c0_71, %c0_72] : memref<1x5x5x48xbf16, #tpu.memory_space<vmem>>, vector<1x4x4x48xbf16>
    %72 = vector.shape_cast %71 : vector<1x4x4x48xbf16> to vector<4x4x48xbf16>
    %73 = vector.shape_cast %72 : vector<4x4x48xbf16> to vector<16x48xbf16>
    %c5 = arith.constant 5 : index
    %c0_73 = arith.constant 0 : index
    %c0_74 = arith.constant 0 : index
    %74 = vector.load %arg2[%c5, %c0_73, %c0_74] : memref<9x48x64xbf16, #tpu.memory_space<vmem>>, vector<1x48x64xbf16>
    %75 = vector.shape_cast %74 : vector<1x48x64xbf16> to vector<48x64xbf16>
    %cst_75 = arith.constant dense<0.000000e+00> : vector<16x64xf32>
    %76 = tpu.matmul %73, %75, %cst_75 {dimension_numbers = #tpu.dot_dimension_numbers<[1], [0], [0], [1], [0, 0, 1, 1], [], []>} : vector<16x48xbf16>, vector<48x64xbf16>, vector<16x64xf32> -> vector<16x64xf32>
    %77 = arith.addf %70, %76 : vector<16x64xf32>
    %c0_76 = arith.constant 0 : index
    %c0_77 = arith.constant 0 : index
    %c1_78 = arith.constant 1 : index
    %c0_79 = arith.constant 0 : index
    %78 = vector.load %arg1[%c0_76, %c0_77, %c1_78, %c0_79] : memref<1x5x5x48xbf16, #tpu.memory_space<vmem>>, vector<1x4x4x48xbf16>
    %79 = vector.shape_cast %78 : vector<1x4x4x48xbf16> to vector<4x4x48xbf16>
    %80 = vector.shape_cast %79 : vector<4x4x48xbf16> to vector<16x48xbf16>
    %c6 = arith.constant 6 : index
    %c0_80 = arith.constant 0 : index
    %c0_81 = arith.constant 0 : index
    %81 = vector.load %arg2[%c6, %c0_80, %c0_81] : memref<9x48x64xbf16, #tpu.memory_space<vmem>>, vector<1x48x64xbf16>
    %82 = vector.shape_cast %81 : vector<1x48x64xbf16> to vector<48x64xbf16>
    %cst_82 = arith.constant dense<0.000000e+00> : vector<16x64xf32>
    %83 = tpu.matmul %80, %82, %cst_82 {dimension_numbers = #tpu.dot_dimension_numbers<[1], [0], [0], [1], [0, 0, 1, 1], [], []>} : vector<16x48xbf16>, vector<48x64xbf16>, vector<16x64xf32> -> vector<16x64xf32>
    %84 = arith.addf %77, %83 : vector<16x64xf32>
    %c0_83 = arith.constant 0 : index
    %c1_84 = arith.constant 1 : index
    %c0_85 = arith.constant 0 : index
    %c0_86 = arith.constant 0 : index
    %85 = vector.load %arg1[%c0_83, %c1_84, %c0_85, %c0_86] : memref<1x5x5x48xbf16, #tpu.memory_space<vmem>>, vector<1x4x4x48xbf16>
    %86 = vector.shape_cast %85 : vector<1x4x4x48xbf16> to vector<4x4x48xbf16>
    %87 = vector.shape_cast %86 : vector<4x4x48xbf16> to vector<16x48xbf16>
    %c7 = arith.constant 7 : index
    %c0_87 = arith.constant 0 : index
    %c0_88 = arith.constant 0 : index
    %88 = vector.load %arg2[%c7, %c0_87, %c0_88] : memref<9x48x64xbf16, #tpu.memory_space<vmem>>, vector<1x48x64xbf16>
    %89 = vector.shape_cast %88 : vector<1x48x64xbf16> to vector<48x64xbf16>
    %cst_89 = arith.constant dense<0.000000e+00> : vector<16x64xf32>
    %90 = tpu.matmul %87, %89, %cst_89 {dimension_numbers = #tpu.dot_dimension_numbers<[1], [0], [0], [1], [0, 0, 1, 1], [], []>} : vector<16x48xbf16>, vector<48x64xbf16>, vector<16x64xf32> -> vector<16x64xf32>
    %91 = arith.addf %84, %90 : vector<16x64xf32>
    %c0_90 = arith.constant 0 : index
    %c1_91 = arith.constant 1 : index
    %c1_92 = arith.constant 1 : index
    %c0_93 = arith.constant 0 : index
    %92 = vector.load %arg1[%c0_90, %c1_91, %c1_92, %c0_93] : memref<1x5x5x48xbf16, #tpu.memory_space<vmem>>, vector<1x4x4x48xbf16>
    %93 = vector.shape_cast %92 : vector<1x4x4x48xbf16> to vector<4x4x48xbf16>
    %94 = vector.shape_cast %93 : vector<4x4x48xbf16> to vector<16x48xbf16>
    %c8 = arith.constant 8 : index
    %c0_94 = arith.constant 0 : index
    %c0_95 = arith.constant 0 : index
    %95 = vector.load %arg2[%c8, %c0_94, %c0_95] : memref<9x48x64xbf16, #tpu.memory_space<vmem>>, vector<1x48x64xbf16>
    %96 = vector.shape_cast %95 : vector<1x48x64xbf16> to vector<48x64xbf16>
    %cst_96 = arith.constant dense<0.000000e+00> : vector<16x64xf32>
    %97 = tpu.matmul %94, %96, %cst_96 {dimension_numbers = #tpu.dot_dimension_numbers<[1], [0], [0], [1], [0, 0, 1, 1], [], []>} : vector<16x48xbf16>, vector<48x64xbf16>, vector<16x64xf32> -> vector<16x64xf32>
    %98 = arith.addf %91, %97 : vector<16x64xf32>
    %c3_97 = arith.constant 3 : index
    %c0_98 = arith.constant 0 : index
    %99 = vector.load %arg3[%c3_97, %c0_98] : memref<4x64xf32, #tpu.memory_space<vmem>>, vector<1x64xf32>
    %100 = vector.broadcast %99 : vector<1x64xf32> to vector<16x64xf32>
    %101 = arith.addf %98, %100 : vector<16x64xf32>
    %cst_99 = arith.constant 0.000000e+00 : f32
    %102 = vector.broadcast %cst_99 : f32 to vector<16x64xf32>
    %103 = arith.maximumf %101, %102 : vector<16x64xf32>
    %c1_100 = arith.constant 1 : index
    %c1_101 = arith.constant 1 : index
    %c0_102 = arith.constant 0 : index
    %104 = vector.load %arg9[%c1_100, %c1_101, %c0_102] : memref<5x5x64xbf16, #tpu.memory_space<vmem>>, vector<4x4x64xbf16>
    %105 = vector.shape_cast %103 : vector<16x64xf32> to vector<4x4x64xf32>
    %106 = arith.truncf %105 : vector<4x4x64xf32> to vector<4x4x64xbf16>
    %107 = arith.addf %104, %106 : vector<4x4x64xbf16>
    %c1_103 = arith.constant 1 : index
    %c1_104 = arith.constant 1 : index
    %c0_105 = arith.constant 0 : index
    %108 = vector.load %arg9[%c1_103, %c1_104, %c0_105] : memref<5x5x64xbf16, #tpu.memory_space<vmem>>, vector<4x4x64xbf16>
    tpu.vector_store %arg9[%c1_103, %c1_104, %c0_105], %107 {strides = array<i32>} : memref<5x5x64xbf16, #tpu.memory_space<vmem>>, vector<4x4x64xbf16>,
    %cst_106 = arith.constant 0.000000e+00 : f32
    %109 = vector.broadcast %cst_106 : f32 to vector<16x128xf32>
    %c0_107 = arith.constant 0 : index
    %c0_108 = arith.constant 0 : index
    %c0_109 = arith.constant 0 : index
    %110 = vector.load %arg9[%c0_107, %c0_108, %c0_109] : memref<5x5x64xbf16, #tpu.memory_space<vmem>>, vector<4x4x64xbf16>
    %111 = vector.shape_cast %110 : vector<4x4x64xbf16> to vector<16x64xbf16>
    %c0_110 = arith.constant 0 : index
    %c0_111 = arith.constant 0 : index
    %c0_112 = arith.constant 0 : index
    %112 = vector.load %arg4[%c0_110, %c0_111, %c0_112] : memref<4x64x128xbf16, #tpu.memory_space<vmem>>, vector<1x64x128xbf16>
    %113 = vector.shape_cast %112 : vector<1x64x128xbf16> to vector<64x128xbf16>
    %cst_113 = arith.constant dense<0.000000e+00> : vector<16x128xf32>
    %114 = tpu.matmul %111, %113, %cst_113 {dimension_numbers = #tpu.dot_dimension_numbers<[1], [0], [0], [1], [0, 0, 1, 1], [], []>} : vector<16x64xbf16>, vector<64x128xbf16>, vector<16x128xf32> -> vector<16x128xf32>
    %115 = arith.addf %109, %114 : vector<16x128xf32>
    %c0_114 = arith.constant 0 : index
    %c1_115 = arith.constant 1 : index
    %c0_116 = arith.constant 0 : index
    %116 = vector.load %arg9[%c0_114, %c1_115, %c0_116] : memref<5x5x64xbf16, #tpu.memory_space<vmem>>, vector<4x4x64xbf16>
    %117 = vector.shape_cast %116 : vector<4x4x64xbf16> to vector<16x64xbf16>
    %c1_117 = arith.constant 1 : index
    %c0_118 = arith.constant 0 : index
    %c0_119 = arith.constant 0 : index
    %118 = vector.load %arg4[%c1_117, %c0_118, %c0_119] : memref<4x64x128xbf16, #tpu.memory_space<vmem>>, vector<1x64x128xbf16>
    %119 = vector.shape_cast %118 : vector<1x64x128xbf16> to vector<64x128xbf16>
    %cst_120 = arith.constant dense<0.000000e+00> : vector<16x128xf32>
    %120 = tpu.matmul %117, %119, %cst_120 {dimension_numbers = #tpu.dot_dimension_numbers<[1], [0], [0], [1], [0, 0, 1, 1], [], []>} : vector<16x64xbf16>, vector<64x128xbf16>, vector<16x128xf32> -> vector<16x128xf32>
    %121 = arith.addf %115, %120 : vector<16x128xf32>
    %c1_121 = arith.constant 1 : index
    %c0_122 = arith.constant 0 : index
    %c0_123 = arith.constant 0 : index
    %122 = vector.load %arg9[%c1_121, %c0_122, %c0_123] : memref<5x5x64xbf16, #tpu.memory_space<vmem>>, vector<4x4x64xbf16>
    %123 = vector.shape_cast %122 : vector<4x4x64xbf16> to vector<16x64xbf16>
    %c2_124 = arith.constant 2 : index
    %c0_125 = arith.constant 0 : index
    %c0_126 = arith.constant 0 : index
    %124 = vector.load %arg4[%c2_124, %c0_125, %c0_126] : memref<4x64x128xbf16, #tpu.memory_space<vmem>>, vector<1x64x128xbf16>
    %125 = vector.shape_cast %124 : vector<1x64x128xbf16> to vector<64x128xbf16>
    %cst_127 = arith.constant dense<0.000000e+00> : vector<16x128xf32>
    %126 = tpu.matmul %123, %125, %cst_127 {dimension_numbers = #tpu.dot_dimension_numbers<[1], [0], [0], [1], [0, 0, 1, 1], [], []>} : vector<16x64xbf16>, vector<64x128xbf16>, vector<16x128xf32> -> vector<16x128xf32>
    %127 = arith.addf %121, %126 : vector<16x128xf32>
    %c1_128 = arith.constant 1 : index
    %c1_129 = arith.constant 1 : index
    %c0_130 = arith.constant 0 : index
    %128 = vector.load %arg9[%c1_128, %c1_129, %c0_130] : memref<5x5x64xbf16, #tpu.memory_space<vmem>>, vector<4x4x64xbf16>
    %129 = vector.shape_cast %128 : vector<4x4x64xbf16> to vector<16x64xbf16>
    %c3_131 = arith.constant 3 : index
    %c0_132 = arith.constant 0 : index
    %c0_133 = arith.constant 0 : index
    %130 = vector.load %arg4[%c3_131, %c0_132, %c0_133] : memref<4x64x128xbf16, #tpu.memory_space<vmem>>, vector<1x64x128xbf16>
    %131 = vector.shape_cast %130 : vector<1x64x128xbf16> to vector<64x128xbf16>
    %cst_134 = arith.constant dense<0.000000e+00> : vector<16x128xf32>
    %132 = tpu.matmul %129, %131, %cst_134 {dimension_numbers = #tpu.dot_dimension_numbers<[1], [0], [0], [1], [0, 0, 1, 1], [], []>} : vector<16x64xbf16>, vector<64x128xbf16>, vector<16x128xf32> -> vector<16x128xf32>
    %133 = arith.addf %127, %132 : vector<16x128xf32>
    %c0_135 = arith.constant 0 : index
    %c0_136 = arith.constant 0 : index
    %134 = vector.load %arg5[%c0_135, %c0_136] : memref<1x128xf32, #tpu.memory_space<vmem>>, vector<1x128xf32>
    %135 = vector.broadcast %134 : vector<1x128xf32> to vector<16x128xf32>
    %136 = arith.addf %133, %135 : vector<16x128xf32>
    %cst_137 = arith.constant 0.000000e+00 : f32
    %137 = vector.broadcast %cst_137 : f32 to vector<16x128xf32>
    %138 = arith.maximumf %136, %137 : vector<16x128xf32>
    %cst_138 = arith.constant dense<0.000000e+00> : vector<128xf32>
    %139 = vector.multi_reduction <add>, %138, %cst_138 [0] : vector<16x128xf32> to vector<128xf32>
    %140 = vector.shape_cast %139 : vector<128xf32> to vector<1x128xf32>
    %cst_139 = arith.constant 6.250000e-02 : f32
    %141 = vector.broadcast %cst_139 : f32 to vector<1x128xf32>
    %142 = arith.mulf %140, %141 : vector<1x128xf32>
    %143 = arith.truncf %142 : vector<1x128xf32> to vector<1x128xbf16>
    %c0_140 = arith.constant 0 : index
    %c0_141 = arith.constant 0 : index
    %144 = vector.load %arg6[%c0_140, %c0_141] : memref<128x128xbf16, #tpu.memory_space<vmem>>, vector<128x128xbf16>
    %cst_142 = arith.constant dense<0.000000e+00> : vector<1x128xf32>
    %145 = tpu.matmul %143, %144, %cst_142 {dimension_numbers = #tpu.dot_dimension_numbers<[1], [0], [0], [1], [0, 0, 1, 1], [], []>} : vector<1x128xbf16>, vector<128x128xbf16>, vector<1x128xf32> -> vector<1x128xf32>
    %c0_143 = arith.constant 0 : index
    %c0_144 = arith.constant 0 : index
    %146 = vector.load %arg7[%c0_143, %c0_144] : memref<1x128xf32, #tpu.memory_space<vmem>>, vector<1x128xf32>
    %147 = arith.addf %145, %146 : vector<1x128xf32>
    %c0_145 = arith.constant 0 : index
    %c0_146 = arith.constant 0 : index
    %c0_147 = arith.constant 0 : index
    %148 = vector.load %arg8[%c0_145, %c0_146, %c0_147] : memref<1x1x128xf32, #tpu.memory_space<vmem>>, vector<1x1x128xf32>
    %149 = vector.shape_cast %148 : vector<1x1x128xf32> to vector<1x128xf32>
    %150 = vector.shape_cast %147 : vector<1x128xf32> to vector<1x1x128xf32>
    tpu.vector_store %arg8[%c0_145, %c0_146, %c0_147], %150 {strides = array<i32>} : memref<1x1x128xf32, #tpu.memory_space<vmem>>, vector<1x1x128xf32>,
    return
  }
  func.func @transform_0(%arg0: i32) -> (i32, i32, i32, i32) {
    %c0_i32 = arith.constant 0 : i32
    %c0_i32_0 = arith.constant 0 : i32
    %c0_i32_1 = arith.constant 0 : i32
    %c0_i32_2 = arith.constant 0 : i32
    return %arg0, %c0_i32, %c0_i32_0, %c0_i32_1 : i32, i32, i32, i32
  }
  func.func @transform_1(%arg0: i32) -> (i32, i32, i32) {
    %c0_i32 = arith.constant 0 : i32
    %c0_i32_0 = arith.constant 0 : i32
    %c0_i32_1 = arith.constant 0 : i32
    %c0_i32_2 = arith.constant 0 : i32
    return %c0_i32, %c0_i32_0, %c0_i32_1 : i32, i32, i32
  }
  func.func @transform_2(%arg0: i32) -> (i32, i32) {
    %c0_i32 = arith.constant 0 : i32
    %c0_i32_0 = arith.constant 0 : i32
    %c0_i32_1 = arith.constant 0 : i32
    return %c0_i32, %c0_i32_0 : i32, i32
  }
  func.func @transform_3(%arg0: i32) -> (i32, i32, i32) {
    %c0_i32 = arith.constant 0 : i32
    %c0_i32_0 = arith.constant 0 : i32
    %c0_i32_1 = arith.constant 0 : i32
    %c0_i32_2 = arith.constant 0 : i32
    return %c0_i32, %c0_i32_0, %c0_i32_1 : i32, i32, i32
  }
  func.func @transform_4(%arg0: i32) -> (i32, i32) {
    %c0_i32 = arith.constant 0 : i32
    %c0_i32_0 = arith.constant 0 : i32
    %c0_i32_1 = arith.constant 0 : i32
    return %c0_i32, %c0_i32_0 : i32, i32
  }
  func.func @transform_5(%arg0: i32) -> (i32, i32) {
    %c0_i32 = arith.constant 0 : i32
    %c0_i32_0 = arith.constant 0 : i32
    %c0_i32_1 = arith.constant 0 : i32
    return %c0_i32, %c0_i32_0 : i32, i32
  }
  func.func @transform_6(%arg0: i32) -> (i32, i32) {
    %c0_i32 = arith.constant 0 : i32
    %c0_i32_0 = arith.constant 0 : i32
    %c0_i32_1 = arith.constant 0 : i32
    return %c0_i32, %c0_i32_0 : i32, i32
  }
  func.func @transform_7(%arg0: i32) -> (i32, i32, i32) {
    %c0_i32 = arith.constant 0 : i32
    %c0_i32_0 = arith.constant 0 : i32
    %c0_i32_1 = arith.constant 0 : i32
    return %arg0, %c0_i32, %c0_i32_0 : i32, i32, i32
  }
}

</mosaic_0001>

<bundles_post_ra>
// kernel: _forward_impl.1
= control target key start
LH: loop header
LB: loop body
LE: loop exit
PB: predicated region body
PF: predicated region fallthrough
CT: control target
= control target key end

     0   :  { %12 = vsyncpa [#allocation4], 0  ;;  %s3574_s0 = inlined_call_operand.vmem [shape: bf16[2,5,5,48], index: 0, kind: input, shape index: {}]   ;;  %s3575_s1 = inlined_call_operand.vmem [shape: bf16[9,48,64], index: 1, kind: input, shape index: {}]   ;;  %s3576_s2 = inlined_call_operand.vmem [shape: f32[4,64], index: 2, kind: input, shape index: {}]   ;;  %s3577_s3 = inlined_call_operand.vmem [shape: bf16[4,64,128], index: 3, kind: input, shape index: {}]   ;;  %s3578_s4 = inlined_call_operand.vmem [shape: f32[1,128], index: 4, kind: input, shape index: {}]   ;;  %s3579_s5 = inlined_call_operand.vmem [shape: bf16[128,128], index: 5, kind: input, shape index: {}]   ;;  %s3580_s6 = inlined_call_operand.vmem [shape: f32[1,128], index: 6, kind: input, shape index: {}]   ;;  %s3581_s7 = inlined_call_operand.hbm [shape: f32[2,1,128], index: 7, kind: output, shape index: {}]  }
   0x1   :  { %14 = vsyncpa [#allocation4 + $0x1], 0  ;;  %s3081_s24 = smov 0   ;;  %s3083_s25 = smov 0  }
   0x2   :  { %s3085_s26 = smov 0   ;;  %s3087_s27 = smov 0  }
   0x3 LB: > { %s3102_s28 = sadd.s32 4294967295, %s3035_s27   ;;  %s2427_s29 = sadd.s32 4294967294, %s3035_s27   ;;  %s3035_s27 = sphi %s3087_s27, %s3597_s27   ;;  %s3031_s26 = sphi %s3085_s26, %s3596_s26   ;;  %s3027_s25 = sphi %s3083_s25, %s3595_s25   ;;  %s3023_s24 = sphi %s3081_s24, %s3594_s24  }
   0x4   : > { %s3106_s30 = sadd.s32 1, %s3035_s27   ;;  %s179_s8 = sadd.s32 1, %s3031_s26 }
   0x5   : > { %s176_s9 = ssub.s32 %s3035_s27, %s3106_s30  ;;  %p189_p0 = scmp.ne.s32.totalorder %s3031_s26, %s3027_s25 }
   0x6   : > { %p177_p1 = scmp.eq.s32.totalorder %s176_s9, 0  ;;  %p190_p2 = scmp.eq.s32.totalorder %s3102_s28, 1 }
   0x7   : > { %p195_p3 = scmp.ne.s32.totalorder %s3027_s25, %s3023_s24  ;;  %p196_p4 = scmp.eq.s32.totalorder %s2427_s29, 1 }
   0x8   : > { %s3117_s10 = scalar_select %p177_p1, %s3031_s26, %s179_s8  }
   0x9   : > { %p3119_p5 = por %p190_p2, %p189_p0  ;;  %p3123_p6 = por %p196_p4, %p195_p3 }
   0xa   : > { %p2430_p7 = scmp.ge.s32.totalorder %s3035_s27, 1  ;;  %p240_p8 = scmp.lt.s32.totalorder %s3035_s27, 3 }
   0xc   : > { %p241_p9 = pnand %p2430_p7, %p240_p8 }
   0xd   : > { %v2890_v0 = vld [vmem:[%s3575_s1] sm:$0xff] (!%p241_p9)   ;;  %v319_v1 = vlaneseq (!%p241_p9)  ;;  %v3037_v2 = vmov (!%p241_p9), 0.0   ;;  %v2891_v3 = vld [vmem:[%s3575_s1 + $0x8] sm:$0xff] (!%p241_p9)   ;;  %vm3038_vm0 = vmmov (!%p241_p9), 0   ;;  %p271_p10 = scmp.lt.s32.totalorder (!%p241_p9), %s3102_s28, 1  ;;  %v2892_v7 = vld [vmem:[%s3575_s1 + $0x10] sm:$0xff] (!%p241_p9)  }
   0xe   : > { %244 = sbr.rel (%p241_p9) target bundleno = 839 (0x347), region = 48  ;;  %2689 = vmatprep.subr.bf16.mxu0 (!%p241_p9), %v3037_v2  ;;  %2719 = vmatprep.subr.bf16.mxu1 (!%p241_p9), %v3037_v2  ;;  %v3039_v4 = vmov (!%p241_p9), 1983009808   ;;  %vm349_vm1 = vcmask (!%p241_p9), 392192   ;;  %vm470_vm2 = vsmask.f32 (!%p241_p9), 1280 }
   0xf   : > { %2690 = vmatpush3.bf16.msra.mxu0 (!%p241_p9), %v2890_v0  ;;  %2695 = vmatprep.mubr.msk.bf16.mxu0 (!%p241_p9), %vm3038_vm0, %v3037_v2  ;;  %v317_v5 = vunpack.c.l.s4 (!%p241_p9), %v3039_v4  ;;  %v320_v6 = vshrl.u32 (!%p241_p9), %v319_v1, 7  ;;  %vm471_vm3 = vsmask.f32 (!%p241_p9), 3336  ;;  %vm473_vm4 = vsmask.f32 (!%p241_p9), 5392  ;;  %v2895_v12 = vld [vmem:[%s3575_s1 + $0x30] sm:$0xff] (!%p241_p9)  }
  0x10   : > { %2691 = vmatprep.subr.bf16.mxu0 (!%p241_p9), %v3037_v2  ;;  %2725 = vmatprep.mubr.msk.bf16.mxu1 (!%p241_p9), %vm3038_vm0, %v3037_v2  ;;  %vm475_vm5 = vsmask.f32 (!%p241_p9), 7448  ;;  %vm3163_vm6 = vmor (!%p241_p9), %vm470_vm2, %vm471_vm3  ;;  %v2899_v18 = vld [vmem:[%s3575_s1 + $0x60] sm:$0xff] (!%p241_p9)   ;;  %v2896_v28 = vld [vmem:[%s3575_s1 + $0x38] sm:$0xff] (!%p241_p9)   ;;  %vm277_vm9 = vcmask (!%p241_p9), 518144   ;;  %vm414_vm12 = vcmask (!%p241_p9), 517120  }
  0x11   : > { %v318_v8 = vunpack.c.0.s8 (!%p241_p9), %v317_v5  ;;  %2720 = vmatpush3.bf16.msra.mxu1 (!%p241_p9), %v2899_v18  ;;  %vm3178_vm7 = vmor (!%p241_p9), %vm3163_vm6, %vm473_vm4  ;;  %v2901_v42 = vld [vmem:[%s3575_s1 + $0x68] sm:$0xff] (!%p241_p9)   ;;  %v2897_v48 = vld [vmem:[%s3575_s1 + $0x40] sm:$0xff] (!%p241_p9)   ;;  %vm278_vm10 = vsmask.f32 (!%p241_p9), 2304  ;;  %vm773_vm13 = vsmask.f32 (!%p241_p9), 2306 }
  0x12   : > { %2721 = vmatprep.subr.bf16.mxu1 (!%p241_p9), %v3037_v2  ;;  %vm3193_vm8 = vmor (!%p241_p9), %vm3178_vm7, %vm475_vm5  ;;  %v2903_v58 = vld [vmem:[%s3575_s1 + $0x70] sm:$0xff] (!%p241_p9)   ;;  %v2900_v16 = vld [vmem:[%s3575_s1 + $0x20] sm:$0xff] (!%p241_p9)   ;;  %vm1803_vm15 = vcmask (!%p241_p9), 523264   ;;  %s2613_s29 = sshll.u32 (!%p241_p9), %s3102_s28, 4  ;;  %s3040_s16 = smov (!%p241_p9), [#allocation3]  }
  0x13   : > { %2692 = vmatpush3.bf16.msra.mxu0 (!%p241_p9), %v2891_v3  ;;  %v3153_v9 = vsub.s32 (!%p241_p9), %v318_v8, %v320_v6  ;;  %v2902_v18 = vld [vmem:[%s3575_s1 + $0x28] sm:$0xff] (!%p241_p9)   ;;  %vm3259_vm11 = vmand (!%p241_p9), %vm277_vm9, %vm278_vm10  ;;  %v2919_v30 = vld [vmem:[%s3575_s1 + $0xb0] sm:$0xff] (!%p241_p9)   ;;  %s3532_s14 = scalar_lea.hbm (!%p241_p9), %s3581_s7, %s2613_s29 }
  0x14   : > { %2693 = vmatprep.subr.bf16.mxu0 (!%p241_p9), %v3037_v2  ;;  %vm3406_vm14 = vmand (!%p241_p9), %vm277_vm9, %vm773_vm13  ;;  %v2944_v43 = vld [vmem:[%s3577_s3 + $0x48] sm:$0xff] (!%p241_p9)  }
  0x15   : > { %s272_s17 = scalar_select %p271_p10, %s3102_s28, 1  ;;  %2722 = vmatpush3.bf16.msra.mxu1 %v2901_v42 }
  0x16   : > { %2723 = vmatprep.subr.bf16.mxu1 %v3037_v2 }
  0x17   : > { %s2847_s20 = smul.u32 20, %s272_s17  ;;  %2694 = vmatpush3.bf16.msra.mxu0 %v2892_v7  ;;  %s2977_s17 = sshll.u32 %s3040_s16, 4  ;;  %s2978_s17 = int_to_ptr.vmem [resolvable:$false] %s2977_s17 }
  0x18   : > { %2699 = vmatprep.subr.bf16.mxu0 %v3037_v2  ;;  %s2979_s18 = scalar_lea.vmem %s2978_s17, 32 }
  0x19   : > { %s3151_s23 = scalar_lea.vmem %s3574_s0, %s2847_s20  ;;  %2724 = vmatpush3.bf16.msra.mxu1 %v2903_v58  ;;  %s269_s20 = sand.u32 1, %s3027_s25  }
  0x1a   : > { %v2957_v10 = vld.sshfl [vmem:[%s3151_s23] sm:$0xf pattern:$0x76325410]  ;;  %2739 = vmatprep.subr.bf16.mxu1 %v3037_v2  ;;  %s2360_s15 = scalar_lea.sflag [#allocation4], %s269_s20 }
  0x1b   : > { %v2958_v11 = vld.sshfl [vmem:[%s3151_s23 + $0x8] sm:$0xf pattern:$0x76325410] }
  0x1c   : > { %v2443_v13 = vld.sshfl [vmem:[%s3151_s23] sm:$0x13 pattern:$0x76325410]  ;;  %v330_v23 = vcombine.low %v2957_v10, %v2958_v11  ;;  %v2898_v10 = vld [vmem:[%s3575_s1 + $0x18] sm:$0xff]  }
  0x1d   : > { %v2444_v14 = vld.sshfl [vmem:[%s3151_s23 + $0x4] sm:$0x13 pattern:$0x76325410]  ;;  %v445_v15 = vcombine.high %v2443_v13, %v2443_v13  ;;  %v478_v17 = vshrl.u32 %v2443_v13, 16  ;;  %v481_v21 = vshll.u32 %v2443_v13, 16 }
  0x1e   : > { %v2445_v19 = vld.sshfl [vmem:[%s3151_s23 + $0x8] sm:$0x13 pattern:$0x76325410]  ;;  %v453_v20 = vcombine.high %v2444_v14, %v2444_v14  ;;  %v492_v22 = vshrl.u32 %v2444_v14, 16  ;;  %v495_v33 = vshll.u32 %v2444_v14, 16  ;;  %2696 = vmatmul.mubr.msk.bf16.vlgmr.msra.gmra.mrb[0].mxu0 %vm349_vm1, %v330_v23 }
  0x1f   : > { %v2446_v24 = vld.sshfl [vmem:[%s3151_s23 + $0xc] sm:$0x13 pattern:$0x76325410]  ;;  %v461_v25 = vcombine.high %v2445_v19, %v2445_v19  ;;  %v480_v26 = vrot.slane %v478_v17, 6  ;;  %v487_v27 = vshll.u32 %v445_v15, 16  ;;  %2700 = vmatpush3.bf16.msra.mxu0 %v2895_v12  ;;  %2705 = vmatprep.mubr.msk.bf16.mxu0 %vm3038_vm0, %v3037_v2 }
  0x20   : > { %v469_v29 = vcombine.high %v2446_v24, %v2446_v24  ;;  %v483_v31 = vrot.slane %v481_v21, 7  ;;  %v494_v32 = vrot.slane %v492_v22, 6  ;;  %v501_v35 = vshll.u32 %v453_v20, 16  ;;  %2701 = vmatprep.subr.bf16.mxu0 %v3037_v2  ;;  %v2909_v14 = vld [vmem:[%s3575_s1 + $0x90] sm:$0xff]   ;;  %v2911_v17 = vld [vmem:[%s3575_s1 + $0x98] sm:$0xff]   ;;  %v2906_v22 = vld [vmem:[%s3575_s1 + $0x48] sm:$0xff]  }
  0x21   : > { %v489_v34 = vrot.slane %v487_v27, 7  ;;  %v506_v36 = vshrl.u32 %v2445_v19, 16  ;;  %v509_v37 = vshll.u32 %v2445_v19, 16  ;;  %v497_v39 = vrot.slane %v495_v33, 7  ;;  %v2913_v19 = vld [vmem:[%s3575_s1 + $0xa0] sm:$0xff]  }
  0x22   : > { %v484_v38 = vor.u32 %v483_v31, %v480_v26  ;;  %v515_v40 = vshll.u32 %v461_v25, 16  ;;  %v520_v41 = vshrl.u32 %v2446_v24, 16  ;;  %v503_v44 = vrot.slane %v501_v35, 7  ;;  %v2910_v25 = vld [vmem:[%s3575_s1 + $0x50] sm:$0xff]  }
  0x23   : > { %v508_v45 = vrot.slane %v506_v36, 6  ;;  %v511_v46 = vrot.slane %v509_v37, 7  ;;  %v523_v47 = vshll.u32 %v2446_v24, 16  ;;  %v498_v50 = vor.u32 %v497_v39, %v494_v32  ;;  %2702 = vmatpush3.bf16.msra.mxu0 %v2896_v28  ;;  %v2917_v24 = vld [vmem:[%s3575_s1 + $0xa8] sm:$0xff]   ;;  %v283_v36 = vld [vmem:[#allocation2 + $0x4] sm:$0x7] }
  0x24   : > { %v485_v49 = vrot.slane %v484_v38, 2  ;;  %v517_v51 = vrot.slane %v515_v40, 7  ;;  %v522_v52 = vrot.slane %v520_v41, 6  ;;  %v529_v55 = vshll.u32 %v469_v29, 16  ;;  %2703 = vmatprep.subr.bf16.mxu0 %v3037_v2  ;;  %v280_v29 = vld [vmem:[#allocation2] sm:$0x7] }
  0x25   : > { %v512_v53 = vor.u32 %v511_v46, %v508_v45  ;;  %v525_v54 = vrot.slane %v523_v47, 7  ;;  %v499_v57 = vrot.slane %v498_v50, 2  ;;  %v2959_v6 = vld.sshfl [vmem:[%s3151_s23 + $0x4] sm:$0xf pattern:$0x76325410] }
  0x26   : > { %v490_v56 = vsel %vm3193_vm8, %v485_v49, %v489_v34  ;;  %v531_v61 = vrot.slane %v529_v55, 7  ;;  %v2960_v7 = vld.sshfl [vmem:[%s3151_s23 + $0xc] sm:$0xf pattern:$0x76325410]  ;;  %v281_v32 = vsel %vm3259_vm11, 0, %v280_v29 }
  0x27   : > { %v513_v59 = vrot.slane %v512_v53, 2  ;;  %v526_v60 = vor.u32 %v525_v54, %v522_v52  ;;  %v3209_v62 = vsel %vm3193_vm8, %v499_v57, %v503_v44  ;;  %2704 = vmatpush3.bf16.msra.mxu0 %v2897_v48  ;;  %v2961_v12 = vld.sshfl [vmem:[%s3151_s23] sm:$0xf pattern:$0x76325410]  ;;  %v829_v13 = vcombine.low %v2959_v6, %v2960_v7  ;;  %v2912_v37 = vld [vmem:[%s3575_s1 + $0x58] sm:$0xff]  }
  0x28   : > { %v540_v1 = vcombine.low %v490_v56, %v3209_v62  ;;  %2709 = vmatprep.subr.bf16.mxu0 %v3037_v2  ;;  %v2962_v15 = vld.sshfl [vmem:[%s3151_s23 + $0x8] sm:$0xf pattern:$0x76325410]  ;;  %282 = vst [vmem:[#allocation2] sm:$0x7] %v281_v32 }
  0x29   : > { %v3213_v63 = vsel %vm3193_vm8, %v513_v59, %v517_v51  ;;  %v527_v0 = vrot.slane %v526_v60, 2  ;;  %2726 = vmatmul.mubr.msk.bf16.vlgmr.msra.gmra.mrb[0].mxu1 %vm349_vm1, %v829_v13  ;;  %v639_v21 = vcombine.low %v2961_v12, %v2962_v15  ;;  %v2963_v23 = vld.sshfl [vmem:[%s3151_s23] sm:$0xf pattern:$0x76325410]  ;;  %v284_v38 = vsel %vm3259_vm11, 0, %v283_v36 }
  0x2a   : > { %v548_v5 = vrot.slane %v540_v1, %v3153_v9  ;;  %2740 = vmatpush3.bf16.msra.mxu1 %v2909_v14  ;;  %2745 = vmatprep.mubr.msk.bf16.mxu1 %vm3038_vm0, %v3037_v2  ;;  %v2964_v26 = vld.sshfl [vmem:[%s3151_s23 + $0x8] sm:$0xf pattern:$0x76325410]  ;;  %v2921_v39 = vld [vmem:[%s3575_s1 + $0xb8] sm:$0xff]   ;;  %v2918_v52 = vld [vmem:[%s3575_s1 + $0x80] sm:$0xff]   ;;  %v1482_v57 = vcombine.low %v3209_v62, %v3213_v63 }
  0x2b   : > { %v3219_v3 = vsel %vm3193_vm8, %v527_v0, %v531_v61  ;;  %2741 = vmatprep.subr.bf16.mxu1 %v3037_v2  ;;  %v2965_v27 = vld.sshfl [vmem:[%s3151_s23 + $0x4] sm:$0xf pattern:$0x76325410]  ;;  %285 = vst [vmem:[#allocation2 + $0x4] sm:$0x7] %v284_v38  ;;  %v912_v44 = vcombine.low %v2963_v23, %v2964_v26 }
  0x2c   : > { %v541_v4 = vcombine.low %v3213_v63, %v3219_v3  ;;  %v2966_v28 = vld.sshfl [vmem:[%s3151_s23 + $0xc] sm:$0xf pattern:$0x76325410]  ;;  %v2916_v45 = vld [vmem:[%s3575_s1 + $0x78] sm:$0xff]   ;;  %v2924_v54 = vld [vmem:[%s3575_s1 + $0xc0] sm:$0xff]   ;;  %v1490_v60 = vrot.slane %v1482_v57, %v3153_v9 }
  0x2d   : > { %v2536_v31 = vld.sshfl [vmem:[%s3151_s23 + $0x10] sm:$0x13 pattern:$0x76325410]  ;;  %v1314_v49 = vcombine.low %v2965_v27, %v2966_v28  ;;  %v2920_v53 = vld [vmem:[%s3575_s1 + $0x88] sm:$0xff]   ;;  %v2929_v7 = vld [vmem:[%s3577_s3] sm:$0xff]  }
  0x2e   : > { %v555_v8 = vrot.slane %v541_v4, %v3153_v9  ;;  %2742 = vmatpush3.bf16.msra.mxu1 %v2911_v17  ;;  %v1418_v33 = vcombine.high %v2536_v31, %v2536_v31  ;;  %v1462_v34 = vshrl.u32 %v2536_v31, 16  ;;  %v1465_v35 = vshll.u32 %v2536_v31, 16  ;;  %v2967_v47 = vld.sshfl [vmem:[%s3151_s23] sm:$0xf pattern:$0x76325410] }
  0x2f   : > { %2743 = vmatprep.subr.bf16.mxu1 %v3037_v2  ;;  %v2968_v48 = vld.sshfl [vmem:[%s3151_s23 + $0x8] sm:$0xf pattern:$0x76325410]  ;;  %v2928_v62 = vld [vmem:[%s3575_s1 + $0xd0] sm:$0xff]   ;;  %v2933_v13 = vld [vmem:[%s3577_s3 + $0x18] sm:$0xff]  }
  0x30   : > { %v556_v11 = vcombine.low %v548_v5, %v555_v8  ;;  %v1464_v40 = vrot.slane %v1462_v34, 6  ;;  %v1467_v41 = vrot.slane %v1465_v35, 7  ;;  %v1471_v42 = vshll.u32 %v1418_v33, 16  ;;  %v2927_v59 = vld [vmem:[%s3575_s1 + $0xc8] sm:$0xff]   ;;  %v292_v5 = vld [vmem:[#allocation2 + $0x10] sm:$0x7] }
  0x31   : > { %v1220_v55 = vcombine.low %v2967_v47, %v2968_v48  ;;  %v286_v0 = vld [vmem:[#allocation2 + $0x8] sm:$0x7]  ;;  %v293_v6 = vsel %vm3259_vm11, 0, %v292_v5  ;;  %v2938_v14 = vld [vmem:[%s3577_s3 + $0x30] sm:$0xff]   ;;  %v2940_v15 = vld [vmem:[%s3577_s3 + $0x38] sm:$0xff]   ;;  %s270_s23 = scalar_lea.vmem [#allocation3], %s269_s20 }
  0x32   : > { %2706 = vmatmul.mubr.msk.bf16.vlgmr.msra.gmra.mrb[4].mxu0 %vm349_vm1, %v556_v11  ;;  %2744 = vmatpush3.bf16.msra.mxu1 %v2913_v19  ;;  %v1468_v46 = vor.u32 %v1467_v41, %v1464_v40  ;;  %v1473_v51 = vrot.slane %v1471_v42, 7  ;;  %v287_v1 = vsel %vm3259_vm11, 0, %v286_v0  ;;  %294 = vst [vmem:[#allocation2 + $0x10] sm:$0x7] %v293_v6  ;;  %v2930_v8 = vld [vmem:[%s3577_s3 + $0x8] sm:$0xff]   ;;  %s2372_s8 = sshll.u32 %s270_s23, 4  ;;  %s3534_s8 = int_to_ptr.vmem [resolvable:$true] %s2372_s8 }
  0x33   : > { %2710 = vmatpush3.bf16.msra.mxu0 %v2898_v10  ;;  %2715 = vmatprep.mubr.msk.bf16.mxu0 %vm3038_vm0, %v3037_v2  ;;  %288 = vst [vmem:[#allocation2 + $0x8] sm:$0x7] %v287_v1  ;;  %v2931_v10 = vld [vmem:[%s3577_s3 + $0x10] sm:$0xff]   ;;  %v2934_v12 = vld [vmem:[%s3577_s3 + $0x28] sm:$0xff]   ;;  %v397_v28 = vld [vmem:[#allocation2 + $0x4] sm:$0x3]  ;;  %p2980_p0 = scmp.lt.s32.totalorder %s3534_s8, %s2978_s17 }
  0x34   : > { %2711 = vmatprep.subr.bf16.mxu0 %v3037_v2  ;;  %2759 = vmatprep.subr.bf16.mxu1 %v3037_v2  ;;  %v1469_v50 = vrot.slane %v1468_v46, 2  ;;  %s2973_s28 = scalar_lea.vmem %s3534_s8, 16 }
  0x35   : > { %2746 = vmatmul.mubr.msk.bf16.vlgmr.msra.gmra.mrb[4].mxu1 %vm349_vm1, %v556_v11  ;;  %v2932_v11 = vld [vmem:[%s3577_s3 + $0x20] sm:$0xff]   ;;  %p2974_p11 = scmp.ne.s32.totalorder %s3534_s8, %s2973_s28  ;;  %p2981_p1 = scmp.lt.s32.totalorder %s2979_s18, %s2973_s28 }
  0x36   : > { %2760 = vmatpush3.bf16.msra.mxu1 %v2917_v24  ;;  %2765 = vmatprep.mubr.msk.bf16.mxu1 %vm3038_vm0, %v3037_v2  ;;  %v1474_v56 = vsel %vm3193_vm8, %v1469_v50, %v1473_v51  ;;  %v396_v24 = vld [vmem:[#allocation2] sm:$0x3] }
  0x37   : > { %2712 = vmatpush3.bf16.msra.mxu0 %v2900_v16  ;;  %2761 = vmatprep.subr.bf16.mxu1 %v3037_v2  ;;  %v1483_v58 = vcombine.low %v3219_v3, %v1474_v56  ;;  %v289_v3 = vld [vmem:[#allocation2 + $0xc] sm:$0x7]  ;;  %v2432_v16 = vld [vmem:[%s3576_s2] ss:$0 sm:$0xff]  ;;  %p2975_p12 = pnand %p2974_p11, %p3119_p5  ;;  %p2982_p2 = por %p2981_p1, %p2980_p0 }
  0x38   : > { %2713 = vmatprep.subr.bf16.mxu0 %v3037_v2  ;;  %v290_v4 = vsel %vm3259_vm11, 0, %v289_v3 }
  0x39   : > { %v1497_v61 = vrot.slane %v1483_v58, %v3153_v9  ;;  %291 = vst [vmem:[#allocation2 + $0xc] sm:$0x7] %v290_v4  ;;  %p2976_p13 = pneg %p2975_p12 }
  0x3a   : > { %2762 = vmatpush3.bf16.msra.mxu1 %v2919_v30  ;;  %v398_v29 = vld [vmem:[#allocation2 + $0x8] sm:$0x3] }
  0x3b   : > { %2714 = vmatpush3.bf16.msra.mxu0 %v2902_v18  ;;  %2763 = vmatprep.subr.bf16.mxu1 %v3037_v2  ;;  %v1498_v63 = vcombine.low %v1490_v60, %v1497_v61  ;;  %p2983_p3 = pnand %p2982_p2, %p2976_p13 }
  0x3c   : > { %2729 = vmatprep.subr.bf16.mxu0 %v3037_v2 }
  0x3e   : > { %2716 = vmatmul.mubr.msk.bf16.vlgmr.msra.gmra.mrb[8].mxu0 %vm349_vm1, %v639_v21  ;;  %2764 = vmatpush3.bf16.msra.mxu1 %v2921_v39 }
  0x3f   : > { %2730 = vmatpush3.bf16.msra.mxu0 %v2906_v22  ;;  %2735 = vmatprep.mubr.msk.bf16.mxu0 %vm3038_vm0, %v3037_v2 }
  0x40   : > { %2731 = vmatprep.subr.bf16.mxu0 %v3037_v2  ;;  %2779 = vmatprep.subr.bf16.mxu1 %v3037_v2  ;;  %v399_v34 = vld [vmem:[#allocation2 + $0xc] sm:$0x3] }
  0x41   : > { %2766 = vmatmul.mubr.msk.bf16.vlgmr.msra.gmra.mrb[8].mxu1 %vm349_vm1, %v1314_v49  ;;  %v2461_v49 = vld [vmem:[%s3576_s2 + $0x1] ss:$0 sm:$0xff] }
  0x42   : > { %2787 = vmatprep.mubr.msk.bf16.mxu1 %vm3038_vm0, %v3037_v2  ;;  %2780 = vmatpush3.bf16.msra.mxu1 %v2932_v11 }
  0x43   : > { %2732 = vmatpush3.bf16.msra.mxu0 %v2910_v25  ;;  %2781 = vmatprep.subr.bf16.mxu1 %v3037_v2 }
  0x44   : > { %2733 = vmatprep.subr.bf16.mxu0 %v3037_v2 }
  0x46   : > { %2782 = vmatpush3.bf16.msra.mxu1 %v2934_v12 }
  0x47   : > { %2734 = vmatpush3.bf16.msra.mxu0 %v2912_v37  ;;  %2783 = vmatprep.subr.bf16.mxu1 %v3037_v2 }
  0x48   : > { %2749 = vmatprep.subr.bf16.mxu0 %v3037_v2 }
  0x4a   : > { %2736 = vmatmul.mubr.msk.bf16.vlgmr.msra.gmra.mrb[12].mxu0 %vm349_vm1, %v912_v44  ;;  %2784 = vmatpush3.bf16.msra.mxu1 %v2938_v14 }
  0x4b   : > { %2750 = vmatpush3.bf16.msra.mxu0 %v2916_v45  ;;  %2755 = vmatprep.mubr.msk.bf16.mxu0 %vm3038_vm0, %v3037_v2 }
  0x4c   : > { %2751 = vmatprep.subr.bf16.mxu0 %v3037_v2  ;;  %2785 = vmatprep.subr.bf16.mxu1 %v3037_v2 }
  0x4e   : > { %2786 = vmatpush3.bf16.msra.mxu1 %v2940_v15 }
  0x4f   : > { %2752 = vmatpush3.bf16.msra.mxu0 %v2918_v52  ;;  %2803 = vmatprep.subr.bf16.mxu1 %v3037_v2 }
  0x50   : > { %2753 = vmatprep.subr.bf16.mxu0 %v3037_v2 }
  0x53   : > { %2754 = vmatpush3.bf16.msra.mxu0 %v2920_v53 }
  0x54   : > { %2769 = vmatprep.subr.bf16.mxu0 %v3037_v2 }
  0x56   : > { %2756 = vmatmul.mubr.msk.bf16.vlgmr.msra.gmra.mrb[16].mxu0 %vm349_vm1, %v1220_v55 }
  0x57   : > { %2770 = vmatpush3.bf16.msra.mxu0 %v2924_v54  ;;  %2775 = vmatprep.mubr.msk.bf16.mxu0 %vm3038_vm0, %v3037_v2 }
  0x58   : > { %2771 = vmatprep.subr.bf16.mxu0 %v3037_v2 }
  0x5b   : > { %2772 = vmatpush3.bf16.msra.mxu0 %v2927_v59 }
  0x5c   : > { %2773 = vmatprep.subr.bf16.mxu0 %v3037_v2 }
  0x5f   : > { %2774 = vmatpush3.bf16.msra.mxu0 %v2928_v62 }
  0x60   : > { %2791 = vmatprep.subr.bf16.mxu0 %v3037_v2 }
  0x62   : > { %2776 = vmatmul.mubr.msk.bf16.vlgmr.msra.gmra.mrb[20].mxu0 %vm349_vm1, %v1498_v63 }
  0x63   : > { %2799 = vmatprep.mubr.msk.bf16.mxu0 %vm3038_vm0, %v3037_v2  ;;  %2792 = vmatpush3.bf16.msra.mxu0 %v2929_v7 }
  0x64   : > { %2793 = vmatprep.subr.bf16.mxu0 %v3037_v2 }
  0x67   : > { %2794 = vmatpush3.bf16.msra.mxu0 %v2930_v8 }
  0x68   : > { %2795 = vmatprep.subr.bf16.mxu0 %v3037_v2 }
  0x6b   : > { %2796 = vmatpush3.bf16.msra.mxu0 %v2931_v10 }
  0x6c   : > { %2797 = vmatprep.subr.bf16.mxu0 %v3037_v2 }
  0x6f   : > { %2798 = vmatpush3.bf16.msra.mxu0 %v2933_v13  ;;  %v2490_v13 = vld [vmem:[%s3576_s2 + $0x2] ss:$0 sm:$0xff] }
  0x70   : > { %2815 = vmatprep.subr.bf16.mxu0 %v3037_v2 }
  0xf1   : > { %v387_v17 = vpop.f32.mrb[0].mxu0 }
  0xf2   : > { %v388_v18 = vadd.f32 %v2432_v16, %v387_v17  ;;  %v2697_v19 = vpop.f32.mrb[1].mxu0 }
  0xf3   : > { %v390_v20 = vpop.f32.mrb[2].mxu0 }
  0xf4   : > { %v394_v21 = vmax.f32 %v388_v18, 0.0  ;;  %v391_v22 = vadd.f32 %v2432_v16, %v390_v20  ;;  %v2698_v23 = vpop.f32.mrb[3].mxu0 }
  0xf6   : > { %v402_v25 = vcombine.high %v394_v21, %v394_v21  ;;  %v406_v26 = vpack.c.bf16 %v394_v21, %v394_v21  ;;  %v395_v27 = vmax.f32 %v391_v22, 0.0 }
  0xf8   : > { %v407_v30 = vpack.c.bf16 %v402_v25, %v402_v25  ;;  %v410_v31 = vadd.bf16 %v406_v26, %v396_v24  ;;  %v403_v32 = vcombine.high %v395_v27, %v395_v27  ;;  %v408_v33 = vpack.c.bf16 %v395_v27, %v395_v27 }
  0xfa   : > { %v411_v35 = vadd.bf16 %v407_v30, %v397_v28  ;;  %415 = vst.msk [vmem:[#allocation2] sm:$0x3] %vm414_vm12, %v410_v31  ;;  %v409_v36 = vpack.c.bf16 %v403_v32, %v403_v32  ;;  %v412_v37 = vadd.bf16 %v408_v33, %v398_v29 }
  0xfc   : > { %416 = vst.msk [vmem:[#allocation2 + $0x4] sm:$0x3] %vm414_vm12, %v411_v35  ;;  %v413_v38 = vadd.bf16 %v409_v36, %v399_v34  ;;  %417 = vst.msk [vmem:[#allocation2 + $0x8] sm:$0x3] %vm414_vm12, %v412_v37  ;;  %v885_v40 = vpop.f32.mrb[0].mxu1 }
  0xfd   : > { %v2727_v42 = vpop.f32.mrb[1].mxu1 }
  0xfe   : > { %418 = vst.msk [vmem:[#allocation2 + $0xc] sm:$0x3] %vm414_vm12, %v413_v38  ;;  %v888_v45 = vpop.f32.mrb[2].mxu1 }
  0xff   : > { %v2728_v47 = vpop.f32.mrb[3].mxu1 }
 0x101   : > { %v711_v14 = vld [vmem:[#allocation2] sm:$0x7] }
 0x103   : > { %v712_v33 = vld [vmem:[#allocation2 + $0x4] sm:$0x7] }
 0x105   : > { %v612_v39 = vpop.f32.mrb[4].mxu0 }
 0x106   : > { %v2707_v41 = vpop.f32.mrb[5].mxu0 }
 0x107   : > { %v615_v44 = vpop.f32.mrb[6].mxu0 }
 0x108   : > { %v2708_v46 = vpop.f32.mrb[7].mxu0  ;;  %v3397_v53 = vpop.f32.mrb[4].mxu1 }
 0x109   : > { %v2747_v57 = vpop.f32.mrb[5].mxu1  ;;  %v714_v46 = vld [vmem:[#allocation2 + $0xc] sm:$0x7] }
 0x10a   : > { %v3399_v58 = vpop.f32.mrb[6].mxu1  ;;  %v988_v57 = vld [vmem:[#allocation2 + $0x10] sm:$0x3] }
 0x10b   : > { %v2748_v61 = vpop.f32.mrb[7].mxu1 }
 0x111   : > { %v695_v48 = vpop.f32.mrb[8].mxu0 }
 0x112   : > { %v696_v50 = vadd.f32 %v695_v48, %v612_v39  ;;  %v2717_v51 = vpop.f32.mrb[9].mxu0  ;;  %v713_v39 = vld [vmem:[#allocation2 + $0x8] sm:$0x7] }
 0x113   : > { %v698_v52 = vpop.f32.mrb[10].mxu0 }
 0x114   : > { %v707_v54 = vadd.f32 %v2461_v49, %v696_v50  ;;  %v699_v55 = vadd.f32 %v698_v52, %v615_v44  ;;  %v2718_v56 = vpop.f32.mrb[11].mxu0  ;;  %v1370_v26 = vpop.f32.mrb[8].mxu1  ;;  %v777_v44 = vld [vmem:[#allocation2 + $0x4] sm:$0x7] }
 0x115   : > { %v2767_v32 = vpop.f32.mrb[9].mxu1 }
 0x116   : > { %v709_v59 = vmax.f32 %v707_v54, 0.0  ;;  %v708_v60 = vadd.f32 %v2461_v49, %v699_v55  ;;  %v1373_v36 = vpop.f32.mrb[10].mxu1  ;;  %v780_v49 = vld [vmem:[#allocation2 + $0x8] sm:$0x7]  ;;  %v783_v54 = vld [vmem:[#allocation2 + $0xc] sm:$0x7] }
 0x118   : > { %v717_v62 = vcombine.high %v709_v59, %v709_v59  ;;  %v2616_v63 = vpack.c.bf16 %v709_v59, %v709_v59  ;;  %v710_v0 = vmax.f32 %v708_v60, 0.0 }
 0x11a   : > { %v2617_v1 = vpack.c.bf16 %v717_v62, %v717_v62  ;;  %v738_v3 = vshrl.u32 %v2616_v63, 16  ;;  %v718_v4 = vcombine.high %v710_v0, %v710_v0  ;;  %v2618_v5 = vpack.c.bf16 %v710_v0, %v710_v0 }
 0x11b   : > { %v741_v7 = vshll.u32 %v2616_v63, 16 }
 0x11c   : > { %v740_v6 = vrot.slane %v738_v3, 7  ;;  %v745_v8 = vshrl.u32 %v2617_v1, 16  ;;  %v2619_v10 = vpack.c.bf16 %v718_v4, %v718_v4  ;;  %v752_v11 = vshrl.u32 %v2618_v5, 16 }
 0x11d   : > { %v968_v12 = vpop.f32.mrb[12].mxu0  ;;  %v748_v17 = vshll.u32 %v2617_v1, 16  ;;  %v755_v22 = vshll.u32 %v2618_v5, 16 }
 0x11e   : > { %v743_v15 = vor.u32 %v741_v7, %v740_v6  ;;  %v747_v16 = vrot.slane %v745_v8, 7  ;;  %v759_v18 = vshrl.u32 %v2619_v10, 16  ;;  %v2737_v19 = vpop.f32.mrb[13].mxu0  ;;  %v754_v21 = vrot.slane %v752_v11, 7 }
 0x11f   : > { %v762_v23 = vshll.u32 %v2619_v10, 16  ;;  %v969_v24 = vadd.f32 %v968_v12, %v885_v40  ;;  %v971_v25 = vpop.f32.mrb[14].mxu0  ;;  %v2768_v40 = vpop.f32.mrb[11].mxu1 }
 0x120   : > { %v750_v27 = vor.u32 %v748_v17, %v747_v16  ;;  %v769_v28 = vadd.bf16 %v743_v15, %v711_v14  ;;  %v761_v29 = vrot.slane %v759_v18, 7  ;;  %v972_v30 = vadd.f32 %v971_v25, %v888_v45  ;;  %v2738_v31 = vpop.f32.mrb[15].mxu0 }
 0x121   : > { %v757_v34 = vor.u32 %v755_v22, %v754_v21  ;;  %v980_v35 = vadd.f32 %v2490_v13, %v969_v24 }
 0x122   : > { %v770_v37 = vadd.bf16 %v750_v27, %v712_v33  ;;  %v775_v38 = vsel %vm3406_vm14, %v769_v28, %v711_v14  ;;  %v764_v41 = vor.u32 %v762_v23, %v761_v29  ;;  %v981_v42 = vadd.f32 %v2490_v13, %v972_v30 }
 0x123   : > { %776 = vst [vmem:[#allocation2] sm:$0x7] %v775_v38  ;;  %v771_v47 = vadd.bf16 %v757_v34, %v713_v39  ;;  %v982_v50 = vmax.f32 %v980_v35, 0.0 }
 0x124   : > { %v778_v45 = vsel %vm3406_vm14, %v770_v37, %v777_v44  ;;  %v772_v48 = vadd.bf16 %v764_v41, %v714_v46  ;;  %v983_v51 = vmax.f32 %v981_v42, 0.0 }
 0x125   : > { %779 = vst [vmem:[#allocation2 + $0x4] sm:$0x7] %v778_v45  ;;  %v781_v52 = vsel %vm3406_vm14, %v771_v47, %v780_v49  ;;  %v991_v59 = vcombine.high %v982_v50, %v982_v50  ;;  %v995_v1 = vpack.c.bf16 %v982_v50, %v982_v50 }
 0x126   : > { %782 = vst [vmem:[#allocation2 + $0x8] sm:$0x7] %v781_v52  ;;  %v784_v55 = vsel %vm3406_vm14, %v772_v48, %v783_v54  ;;  %v992_v56 = vcombine.high %v983_v51, %v983_v51  ;;  %v997_v12 = vpack.c.bf16 %v983_v51, %v983_v51 }
 0x127   : > { %785 = vst [vmem:[#allocation2 + $0xc] sm:$0x7] %v784_v55  ;;  %v996_v5 = vpack.c.bf16 %v991_v59, %v991_v59 }
 0x128   : > { %v998_v60 = vpack.c.bf16 %v992_v56, %v992_v56 }
 0x129   : > { %v1276_v61 = vpop.f32.mrb[16].mxu0 }
 0x12a   : > { %v1002_v62 = vadd.bf16 %v998_v60, %v988_v57  ;;  %v1277_v63 = vadd.f32 %v1276_v61, %v3397_v53  ;;  %v2757_v0 = vpop.f32.mrb[17].mxu0  ;;  %v2552_v52 = vld.sshfl [vmem:[#allocation2] sm:$0x13 pattern:$0x76325410] }
 0x12b   : > { %v1279_v3 = vpop.f32.mrb[18].mxu0 }
 0x12c   : > { %v985_v4 = vld [vmem:[#allocation2 + $0x4] sm:$0x3]  ;;  %1006 = vst.msk [vmem:[#allocation2 + $0x10] sm:$0x3] %vm414_vm12, %v1002_v62  ;;  %v1280_v6 = vadd.f32 %v1279_v3, %v3399_v58  ;;  %v1377_v7 = vadd.f32 %v1370_v26, %v1277_v63  ;;  %v2758_v8 = vpop.f32.mrb[19].mxu0  ;;  %v1701_v3 = vshll.u32 %v2552_v52, 16 }
 0x12d   : > { %v986_v10 = vld [vmem:[#allocation2 + $0x8] sm:$0x3]  ;;  %v999_v11 = vadd.bf16 %v995_v1, %v985_v4  ;;  %v2547_v58 = vld [vmem:[%s3576_s2 + $0x3] ss:$0 sm:$0xff]  ;;  %v1698_v1 = vshrl.u32 %v2552_v52, 16 }
 0x12e   : > { %v1000_v13 = vadd.bf16 %v996_v5, %v986_v10  ;;  %v987_v14 = vld [vmem:[#allocation2 + $0xc] sm:$0x3]  ;;  %v1378_v15 = vadd.f32 %v1373_v36, %v1280_v6  ;;  %v1703_v10 = vrot.slane %v1701_v3, 7 }
 0x12f   : > { %1003 = vst.msk [vmem:[#allocation2 + $0x4] sm:$0x3] %vm414_vm12, %v999_v11  ;;  %v1001_v53 = vadd.bf16 %v997_v12, %v987_v14  ;;  %v1700_v8 = vrot.slane %v1698_v1, 6 }
 0x130   : > { %1004 = vst.msk [vmem:[#allocation2 + $0x8] sm:$0x3] %vm414_vm12, %v1000_v13 }
 0x131   : > { %1005 = vst.msk [vmem:[#allocation2 + $0xc] sm:$0x3] %vm414_vm12, %v1001_v53  ;;  %v1704_v53 = vor.u32 %v1703_v10, %v1700_v8  ;;  %v2943_v8 = vld [vmem:[%s3577_s3 + $0x78] sm:$0xff]  }
 0x133   : > { %v1575_v60 = vld [vmem:[#allocation2 + $0x10] sm:$0x7] }
 0x134   : > { %v1642_v5 = vld [vmem:[#allocation2 + $0x10] sm:$0x7] }
 0x135   : > { %v1554_v16 = vpop.f32.mrb[20].mxu0 }
 0x136   : > { %v1561_v17 = vadd.f32 %v1554_v16, %v1377_v7  ;;  %v2777_v18 = vpop.f32.mrb[21].mxu0  ;;  %v1572_v40 = vld [vmem:[#allocation2 + $0x4] sm:$0x7]  ;;  %v1672_v7 = vcombine.high %v2552_v52, %v2552_v52 }
 0x137   : > { %v1557_v19 = vpop.f32.mrb[22].mxu0  ;;  %v1573_v50 = vld [vmem:[#allocation2 + $0x8] sm:$0x7]  ;;  %v2937_v18 = vld [vmem:[%s3577_s3 + $0x60] sm:$0xff]  }
 0x138   : > { %v1568_v21 = vadd.f32 %v2547_v58, %v1561_v17  ;;  %v1562_v22 = vadd.f32 %v1557_v19, %v1378_v15  ;;  %v2778_v23 = vpop.f32.mrb[23].mxu0  ;;  %v1574_v56 = vld [vmem:[#allocation2 + $0xc] sm:$0x7]  ;;  %v1636_v59 = vld [vmem:[#allocation2 + $0x8] sm:$0x7]  ;;  %v1707_v13 = vshll.u32 %v1672_v7, 16 }
 0x139   : > { %v1639_v0 = vld [vmem:[#allocation2 + $0xc] sm:$0x7] }
 0x13a   : > { %v1570_v24 = vmax.f32 %v1568_v21, 0.0  ;;  %v1569_v25 = vadd.f32 %v2547_v58, %v1562_v22 }
 0x13c   : > { %v1578_v26 = vcombine.high %v1570_v24, %v1570_v24  ;;  %v2620_v27 = vpack.c.bf16 %v1570_v24, %v1570_v24  ;;  %v1571_v28 = vmax.f32 %v1569_v25, 0.0 }
 0x13e   : > { %v2621_v29 = vpack.c.bf16 %v1578_v26, %v1578_v26  ;;  %v1599_v30 = vshrl.u32 %v2620_v27, 16  ;;  %v1579_v31 = vcombine.high %v1571_v28, %v1571_v28  ;;  %v2622_v32 = vpack.c.bf16 %v1571_v28, %v1571_v28 }
 0x13f   : > { %v1602_v34 = vshll.u32 %v2620_v27, 16  ;;  %v1705_v27 = vrot.slane %v1704_v53, 2 }
 0x140   : > { %v1601_v33 = vrot.slane %v1599_v30, 7  ;;  %v1606_v35 = vshrl.u32 %v2621_v29, 16  ;;  %v2623_v36 = vpack.c.bf16 %v1579_v31, %v1579_v31  ;;  %v1613_v37 = vshrl.u32 %v2622_v32, 16 }
 0x141   : > { %v1609_v41 = vshll.u32 %v2621_v29, 16  ;;  %v1616_v46 = vshll.u32 %v2622_v32, 16 }
 0x142   : > { %v1604_v38 = vor.u32 %v1602_v34, %v1601_v33  ;;  %v1608_v39 = vrot.slane %v1606_v35, 7  ;;  %v1620_v42 = vshrl.u32 %v2623_v36, 16  ;;  %v1615_v44 = vrot.slane %v1613_v37, 7 }
 0x143   : > { %v1623_v49 = vshll.u32 %v2623_v36, 16 }
 0x144   : > { %v1611_v47 = vor.u32 %v1609_v41, %v1608_v39  ;;  %v1630_v45 = vadd.bf16 %v1604_v38, %v1572_v40  ;;  %v1622_v48 = vrot.slane %v1620_v42, 7  ;;  %v1618_v51 = vor.u32 %v1616_v46, %v1615_v44  ;;  %v2939_v44 = vld [vmem:[%s3577_s3 + $0x68] sm:$0xff]  }
 0x146   : > { %v1631_v54 = vadd.bf16 %v1611_v47, %v1573_v50  ;;  %v1634_v55 = vsel %vm3406_vm14, %v1630_v45, %v1572_v40  ;;  %v1625_v57 = vor.u32 %v1623_v49, %v1622_v48  ;;  %v1632_v61 = vadd.bf16 %v1618_v51, %v1574_v56 }
 0x147   : > { %1635 = vst [vmem:[#allocation2 + $0x4] sm:$0x7] %v1634_v55  ;;  %v1709_v45 = vrot.slane %v1707_v13, 7 }
 0x148   : > { %v1637_v62 = vsel %vm3406_vm14, %v1631_v54, %v1636_v59  ;;  %v1633_v63 = vadd.bf16 %v1625_v57, %v1575_v60  ;;  %v1640_v4 = vsel %vm3406_vm14, %v1632_v61, %v1639_v0  ;;  %v2941_v60 = vld [vmem:[%s3577_s3 + $0x70] sm:$0xff]  }
 0x149   : > { %1638 = vst [vmem:[#allocation2 + $0x8] sm:$0x7] %v1637_v62  ;;  %1641 = vst [vmem:[#allocation2 + $0xc] sm:$0x7] %v1640_v4  ;;  %v1710_v56 = vsel %vm3193_vm8, %v1705_v27, %v1709_v45 }
 0x14a   : > { %v1643_v6 = vsel %vm3406_vm14, %v1633_v63, %v1642_v5 }
 0x14b   : > { %1644 = vst [vmem:[#allocation2 + $0x10] sm:$0x7] %v1643_v6 }
 0x14e   : > { %v2969_v11 = vld.sshfl [vmem:[#allocation2] sm:$0xf pattern:$0x76325410] }
 0x14f   : > { %v2553_v12 = vld.sshfl [vmem:[#allocation2 + $0x4] sm:$0x13 pattern:$0x76325410] }
 0x150   : > { %v2554_v14 = vld.sshfl [vmem:[#allocation2 + $0x8] sm:$0x13 pattern:$0x76325410]  ;;  %v1680_v15 = vcombine.high %v2553_v12, %v2553_v12  ;;  %v1712_v58 = vshrl.u32 %v2553_v12, 16  ;;  %v1715_v17 = vshll.u32 %v2553_v12, 16 }
 0x151   : > { %v2970_v16 = vld.sshfl [vmem:[#allocation2 + $0x8] sm:$0xf pattern:$0x76325410]  ;;  %v1688_v19 = vcombine.high %v2554_v14, %v2554_v14  ;;  %v1726_v22 = vshrl.u32 %v2554_v14, 16  ;;  %v1729_v30 = vshll.u32 %v2554_v14, 16 }
 0x152   : > { %v2555_v20 = vld.sshfl [vmem:[#allocation2 + $0xc] sm:$0x13 pattern:$0x76325410]  ;;  %v1721_v21 = vshll.u32 %v1680_v15, 16  ;;  %v1714_v24 = vrot.slane %v1712_v58, 6  ;;  %v1868_v31 = vcombine.low %v2969_v11, %v2970_v16 }
 0x153   : > { %v1696_v23 = vcombine.high %v2555_v20, %v2555_v20  ;;  %v1717_v25 = vrot.slane %v1715_v17, 7  ;;  %v2590_v26 = vld.sshfl [vmem:[#allocation2 + $0x10] sm:$0x13 pattern:$0x76325410]  ;;  %v1728_v29 = vrot.slane %v1726_v22, 6 }
 0x154   : > { %v1723_v28 = vrot.slane %v1721_v21, 7  ;;  %v1740_v33 = vshrl.u32 %v2555_v20, 16  ;;  %v1743_v34 = vshll.u32 %v2555_v20, 16  ;;  %v1731_v35 = vrot.slane %v1729_v30, 7  ;;  %2800 = vmatmul.mubr.msk.bf16.vlgmr.msra.gmra.mrb[24].mxu0 %vm1803_vm15, %v1868_v31  ;;  %v2942_v11 = vld [vmem:[%s3577_s3 + $0x40] sm:$0xff]   ;;  %v2946_v17 = vld [vmem:[%s3577_s3 + $0x58] sm:$0xff]  }
 0x155   : > { %v1718_v32 = vor.u32 %v1717_v25, %v1714_v24  ;;  %v1735_v36 = vshll.u32 %v1688_v19, 16  ;;  %v1749_v37 = vshll.u32 %v1696_v23, 16  ;;  %v2080_v38 = vcombine.high %v2590_v26, %v2590_v26  ;;  %2816 = vmatpush3.bf16.msra.mxu0 %v2937_v18  ;;  %2823 = vmatprep.mubr.msk.bf16.mxu0 %vm3038_vm0, %v3037_v2  ;;  %v2971_v16 = vld.sshfl [vmem:[#allocation2 + $0xc] sm:$0xf pattern:$0x76325410] }
 0x156   : > { %v1742_v41 = vrot.slane %v1740_v33, 6  ;;  %v1745_v42 = vrot.slane %v1743_v34, 7  ;;  %v2124_v40 = vshrl.u32 %v2590_v26, 16  ;;  %v1732_v46 = vor.u32 %v1731_v35, %v1728_v29  ;;  %2817 = vmatprep.subr.bf16.mxu0 %v3037_v2  ;;  %v2949_v20 = vld [vmem:[%s3579_s5] sm:$0xff]   ;;  %v2950_v19 = vld [vmem:[%s3579_s5 + $0x8] sm:$0xff]   ;;  %v2951_v21 = vld [vmem:[%s3579_s5 + $0x10] sm:$0xff]  }
 0x157   : > { %v1719_v39 = vrot.slane %v1718_v32, 2  ;;  %v2127_v47 = vshll.u32 %v2590_v26, 16  ;;  %v1737_v52 = vrot.slane %v1735_v36, 7  ;;  %v2133_v55 = vshll.u32 %v2080_v38, 16  ;;  %v2952_v22 = vld [vmem:[%s3579_s5 + $0x18] sm:$0xff]   ;;  %v2953_v23 = vld [vmem:[%s3579_s5 + $0x20] sm:$0xff]  }
 0x158   : > { %v1746_v49 = vor.u32 %v1745_v42, %v1742_v41  ;;  %v2126_v50 = vrot.slane %v2124_v40, 6  ;;  %v1733_v51 = vrot.slane %v1732_v46, 2  ;;  %v1751_v59 = vrot.slane %v1749_v37, 7  ;;  %v2954_v24 = vld [vmem:[%s3579_s5 + $0x28] sm:$0xff]   ;;  %v2955_v25 = vld [vmem:[%s3579_s5 + $0x30] sm:$0xff]   ;;  %v2956_v26 = vld [vmem:[%s3579_s5 + $0x38] sm:$0xff]  }
 0x159   : > { %v1724_v48 = vsel %vm3193_vm8, %v1719_v39, %v1723_v28  ;;  %v2129_v54 = vrot.slane %v2127_v47, 7  ;;  %2818 = vmatpush3.bf16.msra.mxu0 %v2939_v44  ;;  %v2135_v4 = vrot.slane %v2133_v55, 7  ;;  %v2972_v58 = vld.sshfl [vmem:[#allocation2 + $0x4] sm:$0xf pattern:$0x76325410] }
 0x15a   : > { %v1747_v57 = vrot.slane %v1746_v49, 2  ;;  %v1738_v61 = vsel %vm3193_vm8, %v1733_v51, %v1737_v52  ;;  %v1762_v62 = vcombine.low %v1710_v56, %v1724_v48  ;;  %2819 = vmatprep.subr.bf16.mxu0 %v3037_v2  ;;  %v1970_v18 = vcombine.low %v2972_v58, %v2971_v16 }
 0x15b   : > { %v2130_v63 = vor.u32 %v2129_v54, %v2126_v50  ;;  %v2146_v5 = vcombine.low %v1724_v48, %v1738_v61 }
 0x15c   : > { %v1752_v0 = vsel %vm3193_vm8, %v1747_v57, %v1751_v59  ;;  %v1770_v6 = vrot.slane %v1762_v62, %v3153_v9 }
 0x15d   : > { %v1763_v1 = vcombine.low %v1738_v61, %v1752_v0  ;;  %v2131_v3 = vrot.slane %v2130_v63, 2  ;;  %2820 = vmatpush3.bf16.msra.mxu0 %v2941_v60  ;;  %v2154_v14 = vrot.slane %v2146_v5, %v3153_v9 }
 0x15e   : > { %2821 = vmatprep.subr.bf16.mxu0 %v3037_v2 }
 0x15f   : > { %v1777_v7 = vrot.slane %v1763_v1, %v3153_v9  ;;  %v2136_v10 = vsel %vm3193_vm8, %v2131_v3, %v2135_v4  ;;  %v2269_v1 = vld [vmem:[%s3580_s6] sm:$0x1] }
 0x160   : > { %v2147_v12 = vcombine.low %v1752_v0, %v2136_v10 }
 0x161   : > { %v1778_v13 = vcombine.low %v1770_v6, %v1777_v7  ;;  %2822 = vmatpush3.bf16.msra.mxu0 %v2943_v8 }
 0x162   : > { %v2161_v15 = vrot.slane %v2147_v12, %v3153_v9  ;;  %v2945_v9 = vld [vmem:[%s3577_s3 + $0x50] sm:$0xff]  }
 0x163   : > { %2788 = vmatmul.mubr.msk.bf16.vlgmr.msra.gmra.mrb[12].mxu1 %vm1803_vm15, %v1778_v13 }
 0x164   : > { %2804 = vmatpush3.bf16.msra.mxu1 %v2942_v11  ;;  %v2162_v53 = vcombine.low %v2154_v14, %v2161_v15  ;;  %2811 = vmatprep.mubr.msk.bf16.mxu1 %vm3038_vm0, %v3037_v2 }
 0x165   : > { %2805 = vmatprep.subr.bf16.mxu1 %v3037_v2 }
 0x166   : > { %2824 = vmatmul.mubr.msk.bf16.vlgmr.msra.gmra.mrb[28].mxu0 %vm1803_vm15, %v2162_v53 }
 0x168   : > { %2806 = vmatpush3.bf16.msra.mxu1 %v2944_v43 }
 0x169   : > { %2807 = vmatprep.subr.bf16.mxu1 %v3037_v2 }
 0x16c   : > { %2808 = vmatpush3.bf16.msra.mxu1 %v2945_v9 }
 0x16d   : > { %2809 = vmatprep.subr.bf16.mxu1 %v3037_v2 }
 0x170   : > { %2810 = vmatpush3.bf16.msra.mxu1 %v2946_v17 }
 0x171   : > { %2827 = vmatprep.subr.bf16.mxu1 %v3037_v2 }
 0x173   : > { %2812 = vmatmul.mubr.msk.bf16.vlgmr.msra.gmra.mrb[16].mxu1 %vm1803_vm15, %v1970_v18 }
 0x174   : > { %2843 = vmatprep.mubr.msk.bf16.mxu1 %vm3038_vm0, %v3037_v2  ;;  %2828 = vmatpush3.bf16.msra.mxu1 %v2949_v20 }
 0x175   : > { %2829 = vmatprep.subr.bf16.mxu1 %v3037_v2 }
 0x178   : > { %2830 = vmatpush3.bf16.msra.mxu1 %v2950_v19 }
 0x179   : > { %2831 = vmatprep.subr.bf16.mxu1 %v3037_v2 }
 0x17c   : > { %2832 = vmatpush3.bf16.msra.mxu1 %v2951_v21 }
 0x17d   : > { %2833 = vmatprep.subr.bf16.mxu1 %v3037_v2 }
 0x180   : > { %2834 = vmatpush3.bf16.msra.mxu1 %v2952_v22 }
 0x181   : > { %2835 = vmatprep.subr.bf16.mxu1 %v3037_v2 }
 0x184   : > { %2836 = vmatpush3.bf16.msra.mxu1 %v2953_v23 }
 0x185   : > { %2837 = vmatprep.subr.bf16.mxu1 %v3037_v2 }
 0x188   : > { %2838 = vmatpush3.bf16.msra.mxu1 %v2954_v24 }
 0x189   : > { %2839 = vmatprep.subr.bf16.mxu1 %v3037_v2 }
 0x18c   : > { %2840 = vmatpush3.bf16.msra.mxu1 %v2955_v25 }
 0x18d   : > { %2841 = vmatprep.subr.bf16.mxu1 %v3037_v2  ;;  %v2604_v2 = vld [vmem:[%s3578_s4] ss:$0 sm:$0xff] }
 0x190   : > { %2842 = vmatpush3.bf16.msra.mxu1 %v2956_v26 }
 0x227   : > { %v1930_v27 = vpop.f32.mrb[24].mxu0 }
 0x228   : > { %v2801_v28 = vpop.f32.mrb[25].mxu0 }
 0x229   : > { %v1933_v29 = vpop.f32.mrb[26].mxu0 }
 0x22a   : > { %v2802_v30 = vpop.f32.mrb[27].mxu0 }
 0x236   : > { %v1841_v31 = vpop.f32.mrb[12].mxu1 }
 0x237   : > { %v1931_v32 = vadd.f32 %v1930_v27, %v1841_v31  ;;  %v2789_v33 = vpop.f32.mrb[13].mxu1 }
 0x238   : > { %v1844_v34 = vpop.f32.mrb[14].mxu1 }
 0x239   : > { %v1934_v35 = vadd.f32 %v1933_v29, %v1844_v34  ;;  %v2790_v36 = vpop.f32.mrb[15].mxu1  ;;  %v2224_v37 = vpop.f32.mrb[28].mxu0 }
 0x23a   : > { %v2825_v38 = vpop.f32.mrb[29].mxu0 }
 0x23b   : > { %v2227_v39 = vpop.f32.mrb[30].mxu0 }
 0x23c   : > { %v2826_v41 = vpop.f32.mrb[31].mxu0 }
 0x246   : > { %v2032_v42 = vpop.f32.mrb[16].mxu1 }
 0x247   : > { %v2039_v40 = vadd.f32 %v2032_v42, %v1931_v32  ;;  %v2813_v44 = vpop.f32.mrb[17].mxu1 }
 0x248   : > { %v2035_v46 = vpop.f32.mrb[18].mxu1 }
 0x249   : > { %v2231_v47 = vadd.f32 %v2224_v37, %v2039_v40  ;;  %v2040_v45 = vadd.f32 %v2035_v46, %v1934_v35  ;;  %v2814_v48 = vpop.f32.mrb[19].mxu1 }
 0x24b   : > { %v2240_v49 = vadd.f32 %v2604_v2, %v2231_v47  ;;  %v2232_v50 = vadd.f32 %v2227_v39, %v2040_v45 }
 0x24d   : > { %v2241_v51 = vadd.f32 %v2604_v2, %v2232_v50  ;;  %v2242_v52 = vmax.f32 %v2240_v49, 0.0 }
 0x24f   : > { %v2243_v54 = vmax.f32 %v2241_v51, 0.0 }
 0x251   : > { %v2244_v55 = vadd.f32 %v2243_v54, %v2242_v52 }
 0x253   : > { %v2245_v56 = vrot.slane %v2244_v55, 4 }
 0x255   : > { %v2246_v57 = vadd.f32 %v2245_v56, %v2244_v55 }
 0x257   : > { %v2247_v59 = vrot.slane %v2246_v57, 2 }
 0x259   : > { %v2248_v60 = vadd.f32 %v2247_v59, %v2246_v57 }
 0x25b   : > { %v2249_v61 = vrot.slane %v2248_v60, 1 }
 0x25d   : > { %v2250_v62 = vadd.f32 %v2249_v61, %v2248_v60 }
 0x25f   : > { %v2251_v63 = vmul.f32 0.0625, %v2250_v62 }
 0x261   : > { %v2252_v0 = vpack.c.bf16 %v2251_v63, %v2251_v63 }
 0x263   : > { %2844 = vmatmul.mubr.bf16.vlgmr.msra.gmra.mrb[20].mxu1 %v2252_v0 }
 0x336   : > { %v2352_v3 = vpop.f32.mrb[20].mxu1 }
 0x337   : > { %v2353_v4 = vadd.f32 %v2352_v3, %v2269_v1  ;;  %v2845_v5 = vpop.f32.mrb[21].mxu1 }
 0x338   : > { %v2355_v6 = vpop.f32.mrb[22].mxu1 }
 0x339   : > { %2358 = vst [vmem:[%s270_s23] sm:$0x1] %v2353_v4  ;;  %v2846_v7 = vpop.f32.mrb[23].mxu1 }
 0x33a   : > { %2986 = shalt.err (!%p2983_p3)
}
 0x33b   : > { %s2987_s19 = scalar_lea.hbm %s3532_s14, 16  ;;  %s2991_s22 = scalar_lea.hbm %s3581_s7, 32 }
 0x33c   : > { %p2988_p4 = scmp.ne.s32.totalorder %s3532_s14, %s2987_s19  ;;  %p2992_p9 = scmp.lt.u32.totalorder %s3532_s14, %s3581_s7 }
 0x33d   : > { %p2993_p10 = scmp.lt.u32.totalorder %s2991_s22, %s2987_s19  ;;  %p2995_p12 = scmp.lt.u32.totalorder %s2987_s19, %s3532_s14 }
 0x33e   : > { %p2989_p7 = pnand %p2988_p4, %p3119_p5 }
 0x33f   : > { %p2994_p11 = por %p2993_p10, %p2992_p9 }
 0x340   : > { %p2990_p8 = pneg %p2989_p7 }
 0x341   : > { %p2996_p13 = por %p2995_p12, %p2994_p11 }
 0x343   : > { %p2997_p0 = pnand %p2996_p13, %p2990_p8 }
 0x345   : > { %3000 = shalt.err (!%p2997_p0)
}
 0x346   : > { %2848 = dma.vmem_to_hbm [thread:$0]  (%p3119_p5), %s3534_s8, 16, %s3532_s14, %s2360_s15  }
 0x347 PF: > { %p2854_p1 = scmp.ge.s32.totalorder %s3035_s27, 2  ;;  %s2384_s9 = sand.u32 1, %s3023_s24  }
 0x348   : > { %s2385_s13 = scalar_lea.sflag [#allocation4], %s2384_s9 }
 0x349   : > { %p2851_p2 = pnand %p2854_p1, %p3123_p6 }
 0x34b   : > { %3018 = dma.done.wait (!%p2851_p2), %s2385_s13, 16  }
 0x34c   : > { %3020 = vsyncadd (!%p2851_p2), %s2385_s13, 4294967280  ;;  %p17_p3 = scmp.ge.s32.totalorder %s3106_s30, 4   ;;  %s3594_s24 = smov %s3027_s25 }
 0x34d   : > { %s3595_s25 = smov %s3031_s26  ;;  %s3596_s26 = smov %s3117_s10 }
 0x34e   : > { %s3597_s27 = smov %s3106_s30  ;;  %19 = sbr.rel (!%p17_p3) target bundleno = 3 (0x3), region = 96 }
 0x355   :  { %2389 = vsyncpa [#allocation4], 1 }
 0x356   :  { %2391 = vsyncpa [#allocation4 + $0x1], 1 }

</bundles_post_ra>
